<compile_context>
chip_gen: v5e
topology: v5e:2x2
jax: 0.10.0
libtpu: 0.0.40
codegen_flags: <defaults>
</compile_context>

<pallas_src>
import jax
import jax.numpy as jnp
import numpy as np
from jax.experimental import pallas as pl
from jax.experimental.pallas import tpu as pltpu


# ----------------------------------------------------------------------------
# Kernel factory: Bt batch elements per grid step, rows = (batch, time),
# lanes = channels.
# ----------------------------------------------------------------------------
def _make_kernel(C_out, T, K, pad, n_groups, Bt, use_res_conv, use_3d):
    gs = C_out // n_groups
    R = Bt * T
    inv_count = 1.0 / float(gs * T)
    bf16 = jnp.bfloat16

    def mish(v):
        # v * tanh(softplus(v)) == v * t / (t + 2),  t = e^v * (e^v + 2)
        e = jnp.exp(jnp.minimum(v, 20.0))          # factor is 1.0 in f32 past 20
        t = e * (e + 2.0)
        return v * t * pl.reciprocal(t + 2.0, approx=True)   # EUP, not VALU div

    def kernel(x_ref, scale_ref, shift_ref, tmask_ref,
               w1_ref, b1_ref, g1_ref, be1_ref,
               w2_ref, b2_ref, g2_ref, be2_ref,
               gmat_ref, gmatT_ref, bsel_ref, *rest):
        rest = list(rest)
        bselT_ref = None if use_3d else rest.pop(0)
        wr_ref = br_ref = None
        if use_res_conv:
            wr_ref = rest.pop(0)
            br_ref = rest.pop(0)
        out_ref = rest.pop(0)

        bsel = bsel_ref[...]          # (Bt, R)   one-hot: batch -> rows
        gmat = gmat_ref[...]          # (G, C_out) one-hot: group -> channels
        gmatT = gmatT_ref[...]        # (C_out, G)

        def expand_rows(v_bc):
            # (Bt, C) per-batch values -> broadcastable over the row tile.
            if use_3d:
                return v_bc[:, None, :]              # VPU broadcast over T
            return jnp.dot(bselT_ref[...], v_bc,     # fallback (T not 8-aligned)
                           preferred_element_type=jnp.float32)

        def flat(v):
            return v.reshape(R, v.shape[-1]) if use_3d else v

        def conv_same(v_bf16, w_ref, b_ref):
            # K per-tap MXU dots (bf16 x bf16 -> f32); taps recombined with
            # sublane rolls + precomputed padding/boundary masks.
            acc = jnp.dot(v_bf16, w_ref[pad],
                          preferred_element_type=jnp.float32)       # centre tap
            for k in range(K):
                d = k - pad
                if d == 0:
                    continue
                yk = jnp.dot(v_bf16, w_ref[k],
                             preferred_element_type=jnp.float32)
                yk = pltpu.roll(yk, (-d) % R, axis=0) * tmask_ref[k]
                acc = acc + yk
            return acc + b_ref[...]                                  # (R, C_out)

        def group_norm(h2d, g_ref, be_ref):
            # two-pass (subtract-mean) group statistics; reductions on the MXU
            # (contraction dims R and C_out), broadcasts on the VPU.
            rowsum = jnp.dot(bsel, h2d, preferred_element_type=jnp.float32)
            mean_bg = jnp.dot(rowsum, gmatT,
                              preferred_element_type=jnp.float32) * inv_count
            mean_bc = jnp.dot(mean_bg, gmat, preferred_element_type=jnp.float32)
            if use_3d:
                hc = h2d.reshape(Bt, T, C_out) - mean_bc[:, None, :]
            else:
                hc = h2d - expand_rows(mean_bc)
            hc2 = flat(hc)
            rowsq = jnp.dot(bsel, hc2 * hc2, preferred_element_type=jnp.float32)
            var_bg = jnp.dot(rowsq, gmatT,
                             preferred_element_type=jnp.float32) * inv_count
            inv_bc = jnp.dot(jax.lax.rsqrt(var_bg + 1e-5), gmat,
                             preferred_element_type=jnp.float32)
            return hc * expand_rows(inv_bc) * g_ref[...] + be_ref[...]

        x = x_ref[...]                       # (R, C_in) f32
        xb = x.astype(bf16)

        # ---- block 0: Conv1d -> GroupNorm -> Mish ---------------------------
        h = mish(group_norm(conv_same(xb, w1_ref, b1_ref), g1_ref, be1_ref))

        # ---- FiLM (cond encoder already computed in the wrapper) ------------
        h = expand_rows(scale_ref[0]) * h + expand_rows(shift_ref[0])

        # ---- block 1: Conv1d -> GroupNorm -> Mish ---------------------------
        h = mish(group_norm(conv_same(flat(h).astype(bf16), w2_ref, b2_ref),
                            g2_ref, be2_ref))

        # ---- residual --------------------------------------------------------
        if use_res_conv:
            res = jnp.dot(xb, wr_ref[...],
                          preferred_element_type=jnp.float32) + br_ref[...]
        else:
            res = x
        out_ref[...] = (flat(h) + res).astype(out_ref.dtype)

    return kernel


def _pick_bt(B, T, r_max=1024):
    """Largest divisor of B giving a sublane-aligned row tile R = Bt*T <= r_max,
    preferring >= 2 grid steps (v7x megacore)."""
    divs = [d for d in range(1, B + 1) if B % d == 0]
    aligned = [d for d in divs if (d * T) % 8 == 0]
    if not aligned:
        return B                      # single full-extent tile
    small = [d for d in aligned if d * T <= r_max]
    pool = small if small else [min(aligned)]
    multi = [d for d in pool if B // d >= 2]
    return max(multi) if multi else max(pool)


def _compiler_params():
    kwargs = dict(dimension_semantics=("parallel",))
    try:
        cap = int(pltpu.get_tpu_info().vmem_capacity_bytes)
        if cap >= (100 << 20):                       # v5e / v6e: 128 MiB physical
            kwargs["vmem_limit_bytes"] = 64 << 20
        else:                                        # v7x: 64 MiB/TC, leave headroom
            kwargs["vmem_limit_bytes"] = min(48 << 20, (cap * 3) // 4)
    except Exception:
        pass                                         # let Mosaic use its default
    return pltpu.CompilerParams(**kwargs)


# ----------------------------------------------------------------------------
# Wrapper: parameter plumbing + pallas_call
# ----------------------------------------------------------------------------
def cond_res_block_forward(x, cond, params, *, n_groups=8, kernel_size=3):
    B, C_in, T = x.shape
    C_out = params["w1"].shape[0]
    assert C_out % n_groups == 0
    K = kernel_size
    pad = K // 2
    use_res_conv = (C_in != C_out)
    use_3d = (T % 8 == 0)             # cheap (Bt,T,C) reshapes / broadcasts

    Bt = _pick_bt(B, T)
    R = Bt * T
    n_steps = B // Bt
    f32, bf16 = jnp.float32, jnp.bfloat16

    # ---- relayout: rows = (batch, time), lanes = channels --------------------
    x2d = jnp.transpose(x, (0, 2, 1)).reshape(B * T, C_in).astype(f32)

    # ---- cond encoder hoisted to XLA: Mish -> Linear -> split ----------------
    c = cond.astype(f32)
    emb = (c * jnp.tanh(jax.nn.softplus(c))) @ params["wc"].T.astype(f32) \
        + params["bc"].astype(f32)                                      # (B, 2C)
    scale3 = emb[:, :C_out].reshape(n_steps, Bt, C_out)
    shift3 = emb[:, C_out:].reshape(n_steps, Bt, C_out)

    # ---- weights: (K, C, C_out) bf16 taps; biases/affine as f32 rows ---------
    w1_t = jnp.transpose(params["w1"], (2, 1, 0)).astype(bf16)          # (K,Ci,Co)
    w2_t = jnp.transpose(params["w2"], (2, 1, 0)).astype(bf16)          # (K,Co,Co)
    row = lambda v: v.reshape(1, C_out).astype(f32)
    b1r, g1r, be1r = row(params["b1"]), row(params["g1"]), row(params["be1"])
    b2r, g2r, be2r = row(params["b2"]), row(params["g2"]), row(params["be2"])

    # ---- tiny grid-invariant helper matrices ---------------------------------
    G = n_groups
    gs = C_out // G
    gmat = (jnp.arange(C_out)[None, :] // gs ==
            jnp.arange(G)[:, None]).astype(f32)                         # (G, C_out)
    gmatT = gmat.T
    bsel = (jnp.arange(R)[None, :] // T ==
            jnp.arange(Bt)[:, None]).astype(f32)                        # (Bt, R)

    # per-tap validity masks (conv zero padding + batch boundaries in the folded
    # row tile) — precomputed so the kernel never builds iota/mod masks.
    t_np = np.arange(R) % T
    tmask = jnp.asarray(
        np.stack([((t_np + (k - pad) >= 0) & (t_np + (k - pad) < T))
                  .astype(np.float32) for k in range(K)], axis=0)[:, :, None])

    kernel = _make_kernel(C_out, T, K, pad, n_groups, Bt, use_res_conv, use_3d)

    operands = [x2d, scale3, shift3, tmask,
                w1_t, b1r, g1r, be1r, w2_t, b2r, g2r, be2r,
                gmat, gmatT, bsel]
    if not use_3d:
        operands.append(bsel.T)                                         # (R, Bt)
    if use_res_conv:
        operands.append(params["wr"].T.astype(bf16))                    # (Ci, Co)
        operands.append(params["br"].reshape(1, C_out).astype(f32))

    def _call(single_buffer_consts):
        def cspec(a):
            nd = a.ndim
            idx = lambda i, _n=nd: (0,) * _n
            if single_buffer_consts and hasattr(pl, "Buffered"):
                try:   # grid-invariant: single buffer, no pointless double-buffer
                    return pl.BlockSpec(a.shape, idx, pipeline_mode=pl.Buffered(1))
                except TypeError:
                    pass
            return pl.BlockSpec(a.shape, idx)

        in_specs = ([pl.BlockSpec((R, C_in), lambda i: (i, 0)),          # x rows
                     pl.BlockSpec((1, Bt, C_out), lambda i: (i, 0, 0)),  # FiLM scale
                     pl.BlockSpec((1, Bt, C_out), lambda i: (i, 0, 0))]  # FiLM shift
                    + [cspec(a) for a in operands[3:]])

        return pl.pallas_call(
            kernel,
            out_shape=jax.ShapeDtypeStruct((B * T, C_out), f32),
            grid=(n_steps,),
            in_specs=in_specs,
            out_specs=pl.BlockSpec((R, C_out), lambda i: (i, 0)),
            compiler_params=_compiler_params(),
        )(*operands)

    try:
        out2d = _call(True)
    except Exception:          # fallback if Buffered(1) is unsupported
        out2d = _call(False)

    return out2d.reshape(B, T, C_out).transpose(0, 2, 1)      # back to (B, C_out, T)


# ----------------------------------------------------------------------------
# Pure-JAX reference (mirrors the PyTorch forward) for the correctness check.
# ----------------------------------------------------------------------------
def ref_forward(x, cond, p, *, n_groups=8, kernel_size=3):
    K = kernel_size
    pad = K // 2
    C_out = p["w1"].shape[0]
    mish = lambda v: v * jnp.tanh(jax.nn.softplus(v))

    def conv1d(v, w, b):
        T = v.shape[-1]
        vp = jnp.pad(v, ((0, 0), (0, 0), (pad, pad)))
        out = sum(jnp.einsum("oi,bit->bot", w[:, :, k], vp[:, :, k:k + T])
                  for k in range(K))
        return out + b[None, :, None]

    def gn(h, gamma, beta):
        B, C, T = h.shape
        hg = h.reshape(B, n_groups, -1)
        m = hg.mean(-1, keepdims=True)
        v = hg.var(-1, keepdims=True)
        hn = ((hg - m) * jax.lax.rsqrt(v + 1e-5)).reshape(B, C, T)
        return hn * gamma[None, :, None] + beta[None, :, None]

    h = mish(gn(conv1d(x, p["w1"], p["b1"]), p["g1"], p["be1"]))
    emb = mish(cond) @ p["wc"].T + p["bc"]
    h = emb[:, :C_out][:, :, None] * h + emb[:, C_out:][:, :, None]
    h = mish(gn(conv1d(h, p["w2"], p["b2"]), p["g2"], p["be2"]))
    if "wr" in p:                                   # 1x1 residual conv
        res = jnp.einsum("oi,bit->bot", p["wr"], x) + p["br"][None, :, None]
    else:                                           # nn.Identity
        res = x
    return h + res


# ----------------------------------------------------------------------------
if __name__ == "__main__":
    key = jax.random.PRNGKey(0)
    K = 3
    n_groups = 8

    def make_params(k, C_in, C_out, cond_dim, with_res):
        ks = jax.random.split(k, 12)
        p = {
            "w1": 0.2 * jax.random.normal(ks[0], (C_out, C_in, K), jnp.float32),
            "b1": 0.1 * jax.random.normal(ks[1], (C_out,), jnp.float32),
            "g1": 1.0 + 0.1 * jax.random.normal(ks[2], (C_out,), jnp.float32),
            "be1": 0.1 * jax.random.normal(ks[3], (C_out,), jnp.float32),
            "wc": 0.2 * jax.random.normal(ks[4], (2 * C_out, cond_dim), jnp.float32),
            "bc": 0.1 * jax.random.normal(ks[5], (2 * C_out,), jnp.float32),
            "w2": 0.2 * jax.random.normal(ks[6], (C_out, C_out, K), jnp.float32),
            "b2": 0.1 * jax.random.normal(ks[7], (C_out,), jnp.float32),
            "g2": 1.0 + 0.1 * jax.random.normal(ks[8], (C_out,), jnp.float32),
            "be2": 0.1 * jax.random.normal(ks[9], (C_out,), jnp.float32),
        }
        if with_res:
            p["wr"] = 0.2 * jax.random.normal(ks[10], (C_out, C_in), jnp.float32)
            p["br"] = 0.1 * jax.random.normal(ks[11], (C_out,), jnp.float32)
        return p

    configs = [
        dict(B=2, C_in=4, C_out=16, T=16, cond_dim=6),    # 1x1 residual-conv path
        dict(B=2, C_in=16, C_out=16, T=16, cond_dim=6),   # identity-residual path
    ]
    for cfg in configs:
        kp, kx, kc, key = jax.random.split(key, 4)
        with_res = cfg["C_in"] != cfg["C_out"]
        p = make_params(kp, cfg["C_in"], cfg["C_out"], cfg["cond_dim"], with_res)
        x = jax.random.normal(kx, (cfg["B"], cfg["C_in"], cfg["T"]), jnp.float32)
        cond = jax.random.normal(kc, (cfg["B"], cfg["cond_dim"]), jnp.float32)

        out = jax.block_until_ready(
            cond_res_block_forward(x, cond, p, n_groups=n_groups, kernel_size=K))
        ref = ref_forward(x, cond, p, n_groups=n_groups, kernel_size=K)
        # bf16 matmul operands (f32 accumulation) -> loosened tolerance.
        np.testing.assert_allclose(np.asarray(out), np.asarray(ref),
                                   rtol=5e-2, atol=5e-2)

    print("KERNEL_OK")
</pallas_src>

<mosaic_0001>
module attributes {stable_mosaic.version = 11 : i64} {
  func.func @kernel(%arg0: i32, %arg1: memref<16x4xf32, #tpu.memory_space<vmem>>, %arg2: memref<1x1x16xf32, #tpu.memory_space<vmem>>, %arg3: memref<1x1x16xf32, #tpu.memory_space<vmem>>, %arg4: memref<3x16x1xf32, #tpu.memory_space<vmem>>, %arg5: memref<3x4x16xbf16, #tpu.memory_space<vmem>>, %arg6: memref<1x16xf32, #tpu.memory_space<vmem>>, %arg7: memref<1x16xf32, #tpu.memory_space<vmem>>, %arg8: memref<1x16xf32, #tpu.memory_space<vmem>>, %arg9: memref<3x16x16xbf16, #tpu.memory_space<vmem>>, %arg10: memref<1x16xf32, #tpu.memory_space<vmem>>, %arg11: memref<1x16xf32, #tpu.memory_space<vmem>>, %arg12: memref<1x16xf32, #tpu.memory_space<vmem>>, %arg13: memref<8x16xf32, #tpu.memory_space<vmem>>, %arg14: memref<16x8xf32, #tpu.memory_space<vmem>>, %arg15: memref<1x16xf32, #tpu.memory_space<vmem>>, %arg16: memref<4x16xbf16, #tpu.memory_space<vmem>>, %arg17: memref<1x16xf32, #tpu.memory_space<vmem>>, %arg18: memref<16x16xf32, #tpu.memory_space<vmem>>) attributes {dimension_semantics = [#tpu.dimension_semantics<parallel>], iteration_bounds = array<i64: 2>, scalar_prefetch = 0 : i64, scratch_operands = 0 : i64, tpu.core_type = #tpu.core_type<tc>, window_params = [{transform_indices = @transform_0, window_bounds = array<i64: 16, 4>}, {transform_indices = @transform_1, window_bounds = array<i64: 1, 1, 16>}, {transform_indices = @transform_2, window_bounds = array<i64: 1, 1, 16>}, {pipeline_mode = #tpu.pipeline_mode<synchronous>, transform_indices = @transform_3, window_bounds = array<i64: 3, 16, 1>}, {pipeline_mode = #tpu.pipeline_mode<synchronous>, transform_indices = @transform_4, window_bounds = array<i64: 3, 4, 16>}, {pipeline_mode = #tpu.pipeline_mode<synchronous>, transform_indices = @transform_5, window_bounds = array<i64: 1, 16>}, {pipeline_mode = #tpu.pipeline_mode<synchronous>, transform_indices = @transform_6, window_bounds = array<i64: 1, 16>}, {pipeline_mode = #tpu.pipeline_mode<synchronous>, transform_indices = @transform_7, window_bounds = array<i64: 1, 16>}, {pipeline_mode = #tpu.pipeline_mode<synchronous>, transform_indices = @transform_8, window_bounds = array<i64: 3, 16, 16>}, {pipeline_mode = #tpu.pipeline_mode<synchronous>, transform_indices = @transform_9, window_bounds = array<i64: 1, 16>}, {pipeline_mode = #tpu.pipeline_mode<synchronous>, transform_indices = @transform_10, window_bounds = array<i64: 1, 16>}, {pipeline_mode = #tpu.pipeline_mode<synchronous>, transform_indices = @transform_11, window_bounds = array<i64: 1, 16>}, {pipeline_mode = #tpu.pipeline_mode<synchronous>, transform_indices = @transform_12, window_bounds = array<i64: 8, 16>}, {pipeline_mode = #tpu.pipeline_mode<synchronous>, transform_indices = @transform_13, window_bounds = array<i64: 16, 8>}, {pipeline_mode = #tpu.pipeline_mode<synchronous>, transform_indices = @transform_14, window_bounds = array<i64: 1, 16>}, {pipeline_mode = #tpu.pipeline_mode<synchronous>, transform_indices = @transform_15, window_bounds = array<i64: 4, 16>}, {pipeline_mode = #tpu.pipeline_mode<synchronous>, transform_indices = @transform_16, window_bounds = array<i64: 1, 16>}, {transform_indices = @transform_17, window_bounds = array<i64: 16, 16>}]} {
    %c0 = arith.constant 0 : index
    %c0_0 = arith.constant 0 : index
    %0 = vector.load %arg15[%c0, %c0_0] : memref<1x16xf32, #tpu.memory_space<vmem>>, vector<1x16xf32>
    %c0_1 = arith.constant 0 : index
    %c0_2 = arith.constant 0 : index
    %1 = vector.load %arg13[%c0_1, %c0_2] : memref<8x16xf32, #tpu.memory_space<vmem>>, vector<8x16xf32>
    %c0_3 = arith.constant 0 : index
    %c0_4 = arith.constant 0 : index
    %2 = vector.load %arg14[%c0_3, %c0_4] : memref<16x8xf32, #tpu.memory_space<vmem>>, vector<16x8xf32>
    %c0_5 = arith.constant 0 : index
    %c0_6 = arith.constant 0 : index
    %3 = vector.load %arg1[%c0_5, %c0_6] : memref<16x4xf32, #tpu.memory_space<vmem>>, vector<16x4xf32>
    %4 = arith.truncf %3 : vector<16x4xf32> to vector<16x4xbf16>
    %c1 = arith.constant 1 : index
    %c0_7 = arith.constant 0 : index
    %c0_8 = arith.constant 0 : index
    %5 = vector.load %arg5[%c1, %c0_7, %c0_8] : memref<3x4x16xbf16, #tpu.memory_space<vmem>>, vector<1x4x16xbf16>
    %6 = vector.shape_cast %5 : vector<1x4x16xbf16> to vector<4x16xbf16>
    %cst = arith.constant dense<0.000000e+00> : vector<16x16xf32>
    %7 = tpu.matmul %4, %6, %cst {dimension_numbers = #tpu.dot_dimension_numbers<[1], [0], [0], [1], [0, 0, 1, 1], [], []>} : vector<16x4xbf16>, vector<4x16xbf16>, vector<16x16xf32> -> vector<16x16xf32>
    %c0_9 = arith.constant 0 : index
    %c0_10 = arith.constant 0 : index
    %c0_11 = arith.constant 0 : index
    %8 = vector.load %arg5[%c0_9, %c0_10, %c0_11] : memref<3x4x16xbf16, #tpu.memory_space<vmem>>, vector<1x4x16xbf16>
    %9 = vector.shape_cast %8 : vector<1x4x16xbf16> to vector<4x16xbf16>
    %cst_12 = arith.constant dense<0.000000e+00> : vector<16x16xf32>
    %10 = tpu.matmul %4, %9, %cst_12 {dimension_numbers = #tpu.dot_dimension_numbers<[1], [0], [0], [1], [0, 0, 1, 1], [], []>} : vector<16x4xbf16>, vector<4x16xbf16>, vector<16x16xf32> -> vector<16x16xf32>
    %c1_i32 = arith.constant 1 : i32
    %11 = tpu.dynamic_rotate %10 by %c1_i32 dim 0 : vector<16x16xf32>, i32 -> vector<16x16xf32>
    %c0_13 = arith.constant 0 : index
    %c0_14 = arith.constant 0 : index
    %c0_15 = arith.constant 0 : index
    %12 = vector.load %arg4[%c0_13, %c0_14, %c0_15] : memref<3x16x1xf32, #tpu.memory_space<vmem>>, vector<1x16x1xf32>
    %13 = vector.shape_cast %12 : vector<1x16x1xf32> to vector<16x1xf32>
    %14 = vector.broadcast %13 : vector<16x1xf32> to vector<16x16xf32>
    %15 = arith.mulf %11, %14 : vector<16x16xf32>
    %16 = arith.addf %7, %15 : vector<16x16xf32>
    %c2 = arith.constant 2 : index
    %c0_16 = arith.constant 0 : index
    %c0_17 = arith.constant 0 : index
    %17 = vector.load %arg5[%c2, %c0_16, %c0_17] : memref<3x4x16xbf16, #tpu.memory_space<vmem>>, vector<1x4x16xbf16>
    %18 = vector.shape_cast %17 : vector<1x4x16xbf16> to vector<4x16xbf16>
    %cst_18 = arith.constant dense<0.000000e+00> : vector<16x16xf32>
    %19 = tpu.matmul %4, %18, %cst_18 {dimension_numbers = #tpu.dot_dimension_numbers<[1], [0], [0], [1], [0, 0, 1, 1], [], []>} : vector<16x4xbf16>, vector<4x16xbf16>, vector<16x16xf32> -> vector<16x16xf32>
    %c15_i32 = arith.constant 15 : i32
    %20 = tpu.dynamic_rotate %19 by %c15_i32 dim 0 : vector<16x16xf32>, i32 -> vector<16x16xf32>
    %c2_19 = arith.constant 2 : index
    %c0_20 = arith.constant 0 : index
    %c0_21 = arith.constant 0 : index
    %21 = vector.load %arg4[%c2_19, %c0_20, %c0_21] : memref<3x16x1xf32, #tpu.memory_space<vmem>>, vector<1x16x1xf32>
    %22 = vector.shape_cast %21 : vector<1x16x1xf32> to vector<16x1xf32>
    %23 = vector.broadcast %22 : vector<16x1xf32> to vector<16x16xf32>
    %24 = arith.mulf %20, %23 : vector<16x16xf32>
    %25 = arith.addf %16, %24 : vector<16x16xf32>
    %c0_22 = arith.constant 0 : index
    %c0_23 = arith.constant 0 : index
    %26 = vector.load %arg6[%c0_22, %c0_23] : memref<1x16xf32, #tpu.memory_space<vmem>>, vector<1x16xf32>
    %27 = vector.broadcast %26 : vector<1x16xf32> to vector<16x16xf32>
    %28 = arith.addf %25, %27 : vector<16x16xf32>
    %cst_24 = arith.constant dense<0.000000e+00> : vector<1x16xf32>
    %29 = tpu.matmul %0, %28, %cst_24 {dimension_numbers = #tpu.dot_dimension_numbers<[1], [0], [0], [1], [0, 0, 1, 1], [], []>} : vector<1x16xf32>, vector<16x16xf32>, vector<1x16xf32> -> vector<1x16xf32>
    %cst_25 = arith.constant dense<0.000000e+00> : vector<1x8xf32>
    %30 = tpu.matmul %29, %2, %cst_25 {dimension_numbers = #tpu.dot_dimension_numbers<[1], [0], [0], [1], [0, 0, 1, 1], [], []>} : vector<1x16xf32>, vector<16x8xf32>, vector<1x8xf32> -> vector<1x8xf32>
    %cst_26 = arith.constant 3.125000e-02 : f32
    %31 = vector.broadcast %cst_26 : f32 to vector<1x8xf32>
    %32 = arith.mulf %30, %31 : vector<1x8xf32>
    %cst_27 = arith.constant dense<0.000000e+00> : vector<1x16xf32>
    %33 = tpu.matmul %32, %1, %cst_27 {dimension_numbers = #tpu.dot_dimension_numbers<[1], [0], [0], [1], [0, 0, 1, 1], [], []>} : vector<1x8xf32>, vector<8x16xf32>, vector<1x16xf32> -> vector<1x16xf32>
    %34 = vector.shape_cast %28 : vector<16x16xf32> to vector<1x16x16xf32>
    %35 = vector.shape_cast %33 : vector<1x16xf32> to vector<1x1x16xf32>
    %36 = vector.broadcast %35 : vector<1x1x16xf32> to vector<1x16x16xf32>
    %37 = arith.subf %34, %36 : vector<1x16x16xf32>
    %38 = vector.shape_cast %37 : vector<1x16x16xf32> to vector<16x16xf32>
    %39 = arith.mulf %38, %38 : vector<16x16xf32>
    %cst_28 = arith.constant dense<0.000000e+00> : vector<1x16xf32>
    %40 = tpu.matmul %0, %39, %cst_28 {dimension_numbers = #tpu.dot_dimension_numbers<[1], [0], [0], [1], [0, 0, 1, 1], [], []>} : vector<1x16xf32>, vector<16x16xf32>, vector<1x16xf32> -> vector<1x16xf32>
    %cst_29 = arith.constant dense<0.000000e+00> : vector<1x8xf32>
    %41 = tpu.matmul %40, %2, %cst_29 {dimension_numbers = #tpu.dot_dimension_numbers<[1], [0], [0], [1], [0, 0, 1, 1], [], []>} : vector<1x16xf32>, vector<16x8xf32>, vector<1x8xf32> -> vector<1x8xf32>
    %cst_30 = arith.constant 3.125000e-02 : f32
    %42 = vector.broadcast %cst_30 : f32 to vector<1x8xf32>
    %43 = arith.mulf %41, %42 : vector<1x8xf32>
    %cst_31 = arith.constant 9.99999974E-6 : f32
    %44 = vector.broadcast %cst_31 : f32 to vector<1x8xf32>
    %45 = arith.addf %43, %44 : vector<1x8xf32>
    %46 = math.rsqrt %45 : vector<1x8xf32>
    %cst_32 = arith.constant dense<0.000000e+00> : vector<1x16xf32>
    %47 = tpu.matmul %46, %1, %cst_32 {dimension_numbers = #tpu.dot_dimension_numbers<[1], [0], [0], [1], [0, 0, 1, 1], [], []>} : vector<1x8xf32>, vector<8x16xf32>, vector<1x16xf32> -> vector<1x16xf32>
    %48 = vector.shape_cast %47 : vector<1x16xf32> to vector<1x1x16xf32>
    %49 = vector.broadcast %48 : vector<1x1x16xf32> to vector<1x16x16xf32>
    %50 = arith.mulf %37, %49 : vector<1x16x16xf32>
    %c0_33 = arith.constant 0 : index
    %c0_34 = arith.constant 0 : index
    %51 = vector.load %arg7[%c0_33, %c0_34] : memref<1x16xf32, #tpu.memory_space<vmem>>, vector<1x16xf32>
    %52 = vector.shape_cast %51 : vector<1x16xf32> to vector<1x1x16xf32>
    %53 = vector.broadcast %52 : vector<1x1x16xf32> to vector<1x16x16xf32>
    %54 = arith.mulf %50, %53 : vector<1x16x16xf32>
    %c0_35 = arith.constant 0 : index
    %c0_36 = arith.constant 0 : index
    %55 = vector.load %arg8[%c0_35, %c0_36] : memref<1x16xf32, #tpu.memory_space<vmem>>, vector<1x16xf32>
    %56 = vector.shape_cast %55 : vector<1x16xf32> to vector<1x1x16xf32>
    %57 = vector.broadcast %56 : vector<1x1x16xf32> to vector<1x16x16xf32>
    %58 = arith.addf %54, %57 : vector<1x16x16xf32>
    %cst_37 = arith.constant 2.000000e+01 : f32
    %59 = vector.broadcast %cst_37 : f32 to vector<1x16x16xf32>
    %60 = arith.minimumf %58, %59 : vector<1x16x16xf32>
    %61 = math.exp %60 : vector<1x16x16xf32>
    %cst_38 = arith.constant 2.000000e+00 : f32
    %62 = vector.broadcast %cst_38 : f32 to vector<1x16x16xf32>
    %63 = arith.addf %61, %62 : vector<1x16x16xf32>
    %64 = arith.mulf %61, %63 : vector<1x16x16xf32>
    %65 = arith.mulf %58, %64 : vector<1x16x16xf32>
    %cst_39 = arith.constant 2.000000e+00 : f32
    %66 = vector.broadcast %cst_39 : f32 to vector<1x16x16xf32>
    %67 = arith.addf %64, %66 : vector<1x16x16xf32>
    %68 = tpu.reciprocal %67 {approx = true} : vector<1x16x16xf32> -> vector<1x16x16xf32>
    %69 = arith.mulf %65, %68 : vector<1x16x16xf32>
    %c0_40 = arith.constant 0 : index
    %c0_41 = arith.constant 0 : index
    %c0_42 = arith.constant 0 : index
    %70 = vector.load %arg2[%c0_40, %c0_41, %c0_42] : memref<1x1x16xf32, #tpu.memory_space<vmem>>, vector<1x1x16xf32>
    %71 = vector.shape_cast %70 : vector<1x1x16xf32> to vector<1x16xf32>
    %72 = vector.shape_cast %71 : vector<1x16xf32> to vector<1x1x16xf32>
    %73 = vector.broadcast %72 : vector<1x1x16xf32> to vector<1x16x16xf32>
    %74 = arith.mulf %73, %69 : vector<1x16x16xf32>
    %c0_43 = arith.constant 0 : index
    %c0_44 = arith.constant 0 : index
    %c0_45 = arith.constant 0 : index
    %75 = vector.load %arg3[%c0_43, %c0_44, %c0_45] : memref<1x1x16xf32, #tpu.memory_space<vmem>>, vector<1x1x16xf32>
    %76 = vector.shape_cast %75 : vector<1x1x16xf32> to vector<1x16xf32>
    %77 = vector.shape_cast %76 : vector<1x16xf32> to vector<1x1x16xf32>
    %78 = vector.broadcast %77 : vector<1x1x16xf32> to vector<1x16x16xf32>
    %79 = arith.addf %74, %78 : vector<1x16x16xf32>
    %80 = vector.shape_cast %79 : vector<1x16x16xf32> to vector<16x16xf32>
    %81 = arith.truncf %80 : vector<16x16xf32> to vector<16x16xbf16>
    %c1_46 = arith.constant 1 : index
    %c0_47 = arith.constant 0 : index
    %c0_48 = arith.constant 0 : index
    %82 = vector.load %arg9[%c1_46, %c0_47, %c0_48] : memref<3x16x16xbf16, #tpu.memory_space<vmem>>, vector<1x16x16xbf16>
    %83 = vector.shape_cast %82 : vector<1x16x16xbf16> to vector<16x16xbf16>
    %cst_49 = arith.constant dense<0.000000e+00> : vector<16x16xf32>
    %84 = tpu.matmul %81, %83, %cst_49 {dimension_numbers = #tpu.dot_dimension_numbers<[1], [0], [0], [1], [0, 0, 1, 1], [], []>} : vector<16x16xbf16>, vector<16x16xbf16>, vector<16x16xf32> -> vector<16x16xf32>
    %c0_50 = arith.constant 0 : index
    %c0_51 = arith.constant 0 : index
    %c0_52 = arith.constant 0 : index
    %85 = vector.load %arg9[%c0_50, %c0_51, %c0_52] : memref<3x16x16xbf16, #tpu.memory_space<vmem>>, vector<1x16x16xbf16>
    %86 = vector.shape_cast %85 : vector<1x16x16xbf16> to vector<16x16xbf16>
    %cst_53 = arith.constant dense<0.000000e+00> : vector<16x16xf32>
    %87 = tpu.matmul %81, %86, %cst_53 {dimension_numbers = #tpu.dot_dimension_numbers<[1], [0], [0], [1], [0, 0, 1, 1], [], []>} : vector<16x16xbf16>, vector<16x16xbf16>, vector<16x16xf32> -> vector<16x16xf32>
    %c1_i32_54 = arith.constant 1 : i32
    %88 = tpu.dynamic_rotate %87 by %c1_i32_54 dim 0 : vector<16x16xf32>, i32 -> vector<16x16xf32>
    %c0_55 = arith.constant 0 : index
    %c0_56 = arith.constant 0 : index
    %c0_57 = arith.constant 0 : index
    %89 = vector.load %arg4[%c0_55, %c0_56, %c0_57] : memref<3x16x1xf32, #tpu.memory_space<vmem>>, vector<1x16x1xf32>
    %90 = vector.shape_cast %89 : vector<1x16x1xf32> to vector<16x1xf32>
    %91 = vector.broadcast %90 : vector<16x1xf32> to vector<16x16xf32>
    %92 = arith.mulf %88, %91 : vector<16x16xf32>
    %93 = arith.addf %84, %92 : vector<16x16xf32>
    %c2_58 = arith.constant 2 : index
    %c0_59 = arith.constant 0 : index
    %c0_60 = arith.constant 0 : index
    %94 = vector.load %arg9[%c2_58, %c0_59, %c0_60] : memref<3x16x16xbf16, #tpu.memory_space<vmem>>, vector<1x16x16xbf16>
    %95 = vector.shape_cast %94 : vector<1x16x16xbf16> to vector<16x16xbf16>
    %cst_61 = arith.constant dense<0.000000e+00> : vector<16x16xf32>
    %96 = tpu.matmul %81, %95, %cst_61 {dimension_numbers = #tpu.dot_dimension_numbers<[1], [0], [0], [1], [0, 0, 1, 1], [], []>} : vector<16x16xbf16>, vector<16x16xbf16>, vector<16x16xf32> -> vector<16x16xf32>
    %c15_i32_62 = arith.constant 15 : i32
    %97 = tpu.dynamic_rotate %96 by %c15_i32_62 dim 0 : vector<16x16xf32>, i32 -> vector<16x16xf32>
    %c2_63 = arith.constant 2 : index
    %c0_64 = arith.constant 0 : index
    %c0_65 = arith.constant 0 : index
    %98 = vector.load %arg4[%c2_63, %c0_64, %c0_65] : memref<3x16x1xf32, #tpu.memory_space<vmem>>, vector<1x16x1xf32>
    %99 = vector.shape_cast %98 : vector<1x16x1xf32> to vector<16x1xf32>
    %100 = vector.broadcast %99 : vector<16x1xf32> to vector<16x16xf32>
    %101 = arith.mulf %97, %100 : vector<16x16xf32>
    %102 = arith.addf %93, %101 : vector<16x16xf32>
    %c0_66 = arith.constant 0 : index
    %c0_67 = arith.constant 0 : index
    %103 = vector.load %arg10[%c0_66, %c0_67] : memref<1x16xf32, #tpu.memory_space<vmem>>, vector<1x16xf32>
    %104 = vector.broadcast %103 : vector<1x16xf32> to vector<16x16xf32>
    %105 = arith.addf %102, %104 : vector<16x16xf32>
    %cst_68 = arith.constant dense<0.000000e+00> : vector<1x16xf32>
    %106 = tpu.matmul %0, %105, %cst_68 {dimension_numbers = #tpu.dot_dimension_numbers<[1], [0], [0], [1], [0, 0, 1, 1], [], []>} : vector<1x16xf32>, vector<16x16xf32>, vector<1x16xf32> -> vector<1x16xf32>
    %cst_69 = arith.constant dense<0.000000e+00> : vector<1x8xf32>
    %107 = tpu.matmul %106, %2, %cst_69 {dimension_numbers = #tpu.dot_dimension_numbers<[1], [0], [0], [1], [0, 0, 1, 1], [], []>} : vector<1x16xf32>, vector<16x8xf32>, vector<1x8xf32> -> vector<1x8xf32>
    %cst_70 = arith.constant 3.125000e-02 : f32
    %108 = vector.broadcast %cst_70 : f32 to vector<1x8xf32>
    %109 = arith.mulf %107, %108 : vector<1x8xf32>
    %cst_71 = arith.constant dense<0.000000e+00> : vector<1x16xf32>
    %110 = tpu.matmul %109, %1, %cst_71 {dimension_numbers = #tpu.dot_dimension_numbers<[1], [0], [0], [1], [0, 0, 1, 1], [], []>} : vector<1x8xf32>, vector<8x16xf32>, vector<1x16xf32> -> vector<1x16xf32>
    %111 = vector.shape_cast %105 : vector<16x16xf32> to vector<1x16x16xf32>
    %112 = vector.shape_cast %110 : vector<1x16xf32> to vector<1x1x16xf32>
    %113 = vector.broadcast %112 : vector<1x1x16xf32> to vector<1x16x16xf32>
    %114 = arith.subf %111, %113 : vector<1x16x16xf32>
    %115 = vector.shape_cast %114 : vector<1x16x16xf32> to vector<16x16xf32>
    %116 = arith.mulf %115, %115 : vector<16x16xf32>
    %cst_72 = arith.constant dense<0.000000e+00> : vector<1x16xf32>
    %117 = tpu.matmul %0, %116, %cst_72 {dimension_numbers = #tpu.dot_dimension_numbers<[1], [0], [0], [1], [0, 0, 1, 1], [], []>} : vector<1x16xf32>, vector<16x16xf32>, vector<1x16xf32> -> vector<1x16xf32>
    %cst_73 = arith.constant dense<0.000000e+00> : vector<1x8xf32>
    %118 = tpu.matmul %117, %2, %cst_73 {dimension_numbers = #tpu.dot_dimension_numbers<[1], [0], [0], [1], [0, 0, 1, 1], [], []>} : vector<1x16xf32>, vector<16x8xf32>, vector<1x8xf32> -> vector<1x8xf32>
    %cst_74 = arith.constant 3.125000e-02 : f32
    %119 = vector.broadcast %cst_74 : f32 to vector<1x8xf32>
    %120 = arith.mulf %118, %119 : vector<1x8xf32>
    %cst_75 = arith.constant 9.99999974E-6 : f32
    %121 = vector.broadcast %cst_75 : f32 to vector<1x8xf32>
    %122 = arith.addf %120, %121 : vector<1x8xf32>
    %123 = math.rsqrt %122 : vector<1x8xf32>
    %cst_76 = arith.constant dense<0.000000e+00> : vector<1x16xf32>
    %124 = tpu.matmul %123, %1, %cst_76 {dimension_numbers = #tpu.dot_dimension_numbers<[1], [0], [0], [1], [0, 0, 1, 1], [], []>} : vector<1x8xf32>, vector<8x16xf32>, vector<1x16xf32> -> vector<1x16xf32>
    %125 = vector.shape_cast %124 : vector<1x16xf32> to vector<1x1x16xf32>
    %126 = vector.broadcast %125 : vector<1x1x16xf32> to vector<1x16x16xf32>
    %127 = arith.mulf %114, %126 : vector<1x16x16xf32>
    %c0_77 = arith.constant 0 : index
    %c0_78 = arith.constant 0 : index
    %128 = vector.load %arg11[%c0_77, %c0_78] : memref<1x16xf32, #tpu.memory_space<vmem>>, vector<1x16xf32>
    %129 = vector.shape_cast %128 : vector<1x16xf32> to vector<1x1x16xf32>
    %130 = vector.broadcast %129 : vector<1x1x16xf32> to vector<1x16x16xf32>
    %131 = arith.mulf %127, %130 : vector<1x16x16xf32>
    %c0_79 = arith.constant 0 : index
    %c0_80 = arith.constant 0 : index
    %132 = vector.load %arg12[%c0_79, %c0_80] : memref<1x16xf32, #tpu.memory_space<vmem>>, vector<1x16xf32>
    %133 = vector.shape_cast %132 : vector<1x16xf32> to vector<1x1x16xf32>
    %134 = vector.broadcast %133 : vector<1x1x16xf32> to vector<1x16x16xf32>
    %135 = arith.addf %131, %134 : vector<1x16x16xf32>
    %cst_81 = arith.constant 2.000000e+01 : f32
    %136 = vector.broadcast %cst_81 : f32 to vector<1x16x16xf32>
    %137 = arith.minimumf %135, %136 : vector<1x16x16xf32>
    %138 = math.exp %137 : vector<1x16x16xf32>
    %cst_82 = arith.constant 2.000000e+00 : f32
    %139 = vector.broadcast %cst_82 : f32 to vector<1x16x16xf32>
    %140 = arith.addf %138, %139 : vector<1x16x16xf32>
    %141 = arith.mulf %138, %140 : vector<1x16x16xf32>
    %142 = arith.mulf %135, %141 : vector<1x16x16xf32>
    %cst_83 = arith.constant 2.000000e+00 : f32
    %143 = vector.broadcast %cst_83 : f32 to vector<1x16x16xf32>
    %144 = arith.addf %141, %143 : vector<1x16x16xf32>
    %145 = tpu.reciprocal %144 {approx = true} : vector<1x16x16xf32> -> vector<1x16x16xf32>
    %146 = arith.mulf %142, %145 : vector<1x16x16xf32>
    %c0_84 = arith.constant 0 : index
    %c0_85 = arith.constant 0 : index
    %147 = vector.load %arg16[%c0_84, %c0_85] : memref<4x16xbf16, #tpu.memory_space<vmem>>, vector<4x16xbf16>
    %cst_86 = arith.constant dense<0.000000e+00> : vector<16x16xf32>
    %148 = tpu.matmul %4, %147, %cst_86 {dimension_numbers = #tpu.dot_dimension_numbers<[1], [0], [0], [1], [0, 0, 1, 1], [], []>} : vector<16x4xbf16>, vector<4x16xbf16>, vector<16x16xf32> -> vector<16x16xf32>
    %c0_87 = arith.constant 0 : index
    %c0_88 = arith.constant 0 : index
    %149 = vector.load %arg17[%c0_87, %c0_88] : memref<1x16xf32, #tpu.memory_space<vmem>>, vector<1x16xf32>
    %150 = vector.broadcast %149 : vector<1x16xf32> to vector<16x16xf32>
    %151 = arith.addf %148, %150 : vector<16x16xf32>
    %152 = vector.shape_cast %146 : vector<1x16x16xf32> to vector<16x16xf32>
    %153 = arith.addf %152, %151 : vector<16x16xf32>
    %c0_89 = arith.constant 0 : index
    %c0_90 = arith.constant 0 : index
    %154 = vector.load %arg18[%c0_89, %c0_90] : memref<16x16xf32, #tpu.memory_space<vmem>>, vector<16x16xf32>
    tpu.vector_store %arg18[%c0_89, %c0_90], %153 {strides = array<i32>} : memref<16x16xf32, #tpu.memory_space<vmem>>, vector<16x16xf32>,
    return
  }
  func.func @transform_0(%arg0: i32) -> (i32, i32) {
    %c0_i32 = arith.constant 0 : i32
    %c0_i32_0 = arith.constant 0 : i32
    return %arg0, %c0_i32 : i32, i32
  }
  func.func @transform_1(%arg0: i32) -> (i32, i32, i32) {
    %c0_i32 = arith.constant 0 : i32
    %c0_i32_0 = arith.constant 0 : i32
    %c0_i32_1 = arith.constant 0 : i32
    return %arg0, %c0_i32, %c0_i32_0 : i32, i32, i32
  }
  func.func @transform_2(%arg0: i32) -> (i32, i32, i32) {
    %c0_i32 = arith.constant 0 : i32
    %c0_i32_0 = arith.constant 0 : i32
    %c0_i32_1 = arith.constant 0 : i32
    return %arg0, %c0_i32, %c0_i32_0 : i32, i32, i32
  }
  func.func @transform_3(%arg0: i32) -> (i32, i32, i32) {
    %c0_i32 = arith.constant 0 : i32
    %c0_i32_0 = arith.constant 0 : i32
    %c0_i32_1 = arith.constant 0 : i32
    %c0_i32_2 = arith.constant 0 : i32
    return %c0_i32, %c0_i32_0, %c0_i32_1 : i32, i32, i32
  }
  func.func @transform_4(%arg0: i32) -> (i32, i32, i32) {
    %c0_i32 = arith.constant 0 : i32
    %c0_i32_0 = arith.constant 0 : i32
    %c0_i32_1 = arith.constant 0 : i32
    %c0_i32_2 = arith.constant 0 : i32
    return %c0_i32, %c0_i32_0, %c0_i32_1 : i32, i32, i32
  }
  func.func @transform_5(%arg0: i32) -> (i32, i32) {
    %c0_i32 = arith.constant 0 : i32
    %c0_i32_0 = arith.constant 0 : i32
    %c0_i32_1 = arith.constant 0 : i32
    return %c0_i32, %c0_i32_0 : i32, i32
  }
  func.func @transform_6(%arg0: i32) -> (i32, i32) {
    %c0_i32 = arith.constant 0 : i32
    %c0_i32_0 = arith.constant 0 : i32
    %c0_i32_1 = arith.constant 0 : i32
    return %c0_i32, %c0_i32_0 : i32, i32
  }
  func.func @transform_7(%arg0: i32) -> (i32, i32) {
    %c0_i32 = arith.constant 0 : i32
    %c0_i32_0 = arith.constant 0 : i32
    %c0_i32_1 = arith.constant 0 : i32
    return %c0_i32, %c0_i32_0 : i32, i32
  }
  func.func @transform_8(%arg0: i32) -> (i32, i32, i32) {
    %c0_i32 = arith.constant 0 : i32
    %c0_i32_0 = arith.constant 0 : i32
    %c0_i32_1 = arith.constant 0 : i32
    %c0_i32_2 = arith.constant 0 : i32
    return %c0_i32, %c0_i32_0, %c0_i32_1 : i32, i32, i32
  }
  func.func @transform_9(%arg0: i32) -> (i32, i32) {
    %c0_i32 = arith.constant 0 : i32
    %c0_i32_0 = arith.constant 0 : i32
    %c0_i32_1 = arith.constant 0 : i32
    return %c0_i32, %c0_i32_0 : i32, i32
  }
  func.func @transform_10(%arg0: i32) -> (i32, i32) {
    %c0_i32 = arith.constant 0 : i32
    %c0_i32_0 = arith.constant 0 : i32
    %c0_i32_1 = arith.constant 0 : i32
    return %c0_i32, %c0_i32_0 : i32, i32
  }
  func.func @transform_11(%arg0: i32) -> (i32, i32) {
    %c0_i32 = arith.constant 0 : i32
    %c0_i32_0 = arith.constant 0 : i32
    %c0_i32_1 = arith.constant 0 : i32
    return %c0_i32, %c0_i32_0 : i32, i32
  }
  func.func @transform_12(%arg0: i32) -> (i32, i32) {
    %c0_i32 = arith.constant 0 : i32
    %c0_i32_0 = arith.constant 0 : i32
    %c0_i32_1 = arith.constant 0 : i32
    return %c0_i32, %c0_i32_0 : i32, i32
  }
  func.func @transform_13(%arg0: i32) -> (i32, i32) {
    %c0_i32 = arith.constant 0 : i32
    %c0_i32_0 = arith.constant 0 : i32
    %c0_i32_1 = arith.constant 0 : i32
    return %c0_i32, %c0_i32_0 : i32, i32
  }
  func.func @transform_14(%arg0: i32) -> (i32, i32) {
    %c0_i32 = arith.constant 0 : i32
    %c0_i32_0 = arith.constant 0 : i32
    %c0_i32_1 = arith.constant 0 : i32
    return %c0_i32, %c0_i32_0 : i32, i32
  }
  func.func @transform_15(%arg0: i32) -> (i32, i32) {
    %c0_i32 = arith.constant 0 : i32
    %c0_i32_0 = arith.constant 0 : i32
    %c0_i32_1 = arith.constant 0 : i32
    return %c0_i32, %c0_i32_0 : i32, i32
  }
  func.func @transform_16(%arg0: i32) -> (i32, i32) {
    %c0_i32 = arith.constant 0 : i32
    %c0_i32_0 = arith.constant 0 : i32
    %c0_i32_1 = arith.constant 0 : i32
    return %c0_i32, %c0_i32_0 : i32, i32
  }
  func.func @transform_17(%arg0: i32) -> (i32, i32) {
    %c0_i32 = arith.constant 0 : i32
    %c0_i32_0 = arith.constant 0 : i32
    return %arg0, %c0_i32 : i32, i32
  }
}

module attributes {stable_mosaic.version = 11 : i64} {
  func.func @kernel(%arg0: i32, %arg1: memref<16x4xf32, #tpu.memory_space<vmem>>, %arg2: memref<1x1x16xf32, #tpu.memory_space<vmem>>, %arg3: memref<1x1x16xf32, #tpu.memory_space<vmem>>, %arg4: memref<3x16x1xf32, #tpu.memory_space<vmem>>, %arg5: memref<3x4x16xbf16, #tpu.memory_space<vmem>>, %arg6: memref<1x16xf32, #tpu.memory_space<vmem>>, %arg7: memref<1x16xf32, #tpu.memory_space<vmem>>, %arg8: memref<1x16xf32, #tpu.memory_space<vmem>>, %arg9: memref<3x16x16xbf16, #tpu.memory_space<vmem>>, %arg10: memref<1x16xf32, #tpu.memory_space<vmem>>, %arg11: memref<1x16xf32, #tpu.memory_space<vmem>>, %arg12: memref<1x16xf32, #tpu.memory_space<vmem>>, %arg13: memref<8x16xf32, #tpu.memory_space<vmem>>, %arg14: memref<16x8xf32, #tpu.memory_space<vmem>>, %arg15: memref<1x16xf32, #tpu.memory_space<vmem>>, %arg16: memref<4x16xbf16, #tpu.memory_space<vmem>>, %arg17: memref<1x16xf32, #tpu.memory_space<vmem>>, %arg18: memref<16x16xf32, #tpu.memory_space<vmem>>) attributes {dimension_semantics = [#tpu.dimension_semantics<parallel>], iteration_bounds = array<i64: 2>, scalar_prefetch = 0 : i64, scratch_operands = 0 : i64, tpu.core_type = #tpu.core_type<tc>, window_params = [{transform_indices = @transform_0, window_bounds = array<i64: 16, 4>}, {transform_indices = @transform_1, window_bounds = array<i64: 1, 1, 16>}, {transform_indices = @transform_2, window_bounds = array<i64: 1, 1, 16>}, {pipeline_mode = #tpu.pipeline_mode<synchronous>, transform_indices = @transform_3, window_bounds = array<i64: 3, 16, 1>}, {pipeline_mode = #tpu.pipeline_mode<synchronous>, transform_indices = @transform_4, window_bounds = array<i64: 3, 4, 16>}, {pipeline_mode = #tpu.pipeline_mode<synchronous>, transform_indices = @transform_5, window_bounds = array<i64: 1, 16>}, {pipeline_mode = #tpu.pipeline_mode<synchronous>, transform_indices = @transform_6, window_bounds = array<i64: 1, 16>}, {pipeline_mode = #tpu.pipeline_mode<synchronous>, transform_indices = @transform_7, window_bounds = array<i64: 1, 16>}, {pipeline_mode = #tpu.pipeline_mode<synchronous>, transform_indices = @transform_8, window_bounds = array<i64: 3, 16, 16>}, {pipeline_mode = #tpu.pipeline_mode<synchronous>, transform_indices = @transform_9, window_bounds = array<i64: 1, 16>}, {pipeline_mode = #tpu.pipeline_mode<synchronous>, transform_indices = @transform_10, window_bounds = array<i64: 1, 16>}, {pipeline_mode = #tpu.pipeline_mode<synchronous>, transform_indices = @transform_11, window_bounds = array<i64: 1, 16>}, {pipeline_mode = #tpu.pipeline_mode<synchronous>, transform_indices = @transform_12, window_bounds = array<i64: 8, 16>}, {pipeline_mode = #tpu.pipeline_mode<synchronous>, transform_indices = @transform_13, window_bounds = array<i64: 16, 8>}, {pipeline_mode = #tpu.pipeline_mode<synchronous>, transform_indices = @transform_14, window_bounds = array<i64: 1, 16>}, {pipeline_mode = #tpu.pipeline_mode<synchronous>, transform_indices = @transform_15, window_bounds = array<i64: 4, 16>}, {pipeline_mode = #tpu.pipeline_mode<synchronous>, transform_indices = @transform_16, window_bounds = array<i64: 1, 16>}, {transform_indices = @transform_17, window_bounds = array<i64: 16, 16>}]} {
    %c0 = arith.constant 0 : index
    %c0_0 = arith.constant 0 : index
    %0 = vector.load %arg15[%c0, %c0_0] : memref<1x16xf32, #tpu.memory_space<vmem>>, vector<1x16xf32>
    %c0_1 = arith.constant 0 : index
    %c0_2 = arith.constant 0 : index
    %1 = vector.load %arg13[%c0_1, %c0_2] : memref<8x16xf32, #tpu.memory_space<vmem>>, vector<8x16xf32>
    %c0_3 = arith.constant 0 : index
    %c0_4 = arith.constant 0 : index
    %2 = vector.load %arg14[%c0_3, %c0_4] : memref<16x8xf32, #tpu.memory_space<vmem>>, vector<16x8xf32>
    %c0_5 = arith.constant 0 : index
    %c0_6 = arith.constant 0 : index
    %3 = vector.load %arg1[%c0_5, %c0_6] : memref<16x4xf32, #tpu.memory_space<vmem>>, vector<16x4xf32>
    %4 = arith.truncf %3 : vector<16x4xf32> to vector<16x4xbf16>
    %c1 = arith.constant 1 : index
    %c0_7 = arith.constant 0 : index
    %c0_8 = arith.constant 0 : index
    %5 = vector.load %arg5[%c1, %c0_7, %c0_8] : memref<3x4x16xbf16, #tpu.memory_space<vmem>>, vector<1x4x16xbf16>
    %6 = vector.shape_cast %5 : vector<1x4x16xbf16> to vector<4x16xbf16>
    %cst = arith.constant dense<0.000000e+00> : vector<16x16xf32>
    %7 = tpu.matmul %4, %6, %cst {dimension_numbers = #tpu.dot_dimension_numbers<[1], [0], [0], [1], [0, 0, 1, 1], [], []>} : vector<16x4xbf16>, vector<4x16xbf16>, vector<16x16xf32> -> vector<16x16xf32>
    %c0_9 = arith.constant 0 : index
    %c0_10 = arith.constant 0 : index
    %c0_11 = arith.constant 0 : index
    %8 = vector.load %arg5[%c0_9, %c0_10, %c0_11] : memref<3x4x16xbf16, #tpu.memory_space<vmem>>, vector<1x4x16xbf16>
    %9 = vector.shape_cast %8 : vector<1x4x16xbf16> to vector<4x16xbf16>
    %cst_12 = arith.constant dense<0.000000e+00> : vector<16x16xf32>
    %10 = tpu.matmul %4, %9, %cst_12 {dimension_numbers = #tpu.dot_dimension_numbers<[1], [0], [0], [1], [0, 0, 1, 1], [], []>} : vector<16x4xbf16>, vector<4x16xbf16>, vector<16x16xf32> -> vector<16x16xf32>
    %c1_i32 = arith.constant 1 : i32
    %11 = tpu.dynamic_rotate %10 by %c1_i32 dim 0 : vector<16x16xf32>, i32 -> vector<16x16xf32>
    %c0_13 = arith.constant 0 : index
    %c0_14 = arith.constant 0 : index
    %c0_15 = arith.constant 0 : index
    %12 = vector.load %arg4[%c0_13, %c0_14, %c0_15] : memref<3x16x1xf32, #tpu.memory_space<vmem>>, vector<1x16x1xf32>
    %13 = vector.shape_cast %12 : vector<1x16x1xf32> to vector<16x1xf32>
    %14 = vector.broadcast %13 : vector<16x1xf32> to vector<16x16xf32>
    %15 = arith.mulf %11, %14 : vector<16x16xf32>
    %16 = arith.addf %7, %15 : vector<16x16xf32>
    %c2 = arith.constant 2 : index
    %c0_16 = arith.constant 0 : index
    %c0_17 = arith.constant 0 : index
    %17 = vector.load %arg5[%c2, %c0_16, %c0_17] : memref<3x4x16xbf16, #tpu.memory_space<vmem>>, vector<1x4x16xbf16>
    %18 = vector.shape_cast %17 : vector<1x4x16xbf16> to vector<4x16xbf16>
    %cst_18 = arith.constant dense<0.000000e+00> : vector<16x16xf32>
    %19 = tpu.matmul %4, %18, %cst_18 {dimension_numbers = #tpu.dot_dimension_numbers<[1], [0], [0], [1], [0, 0, 1, 1], [], []>} : vector<16x4xbf16>, vector<4x16xbf16>, vector<16x16xf32> -> vector<16x16xf32>
    %c15_i32 = arith.constant 15 : i32
    %20 = tpu.dynamic_rotate %19 by %c15_i32 dim 0 : vector<16x16xf32>, i32 -> vector<16x16xf32>
    %c2_19 = arith.constant 2 : index
    %c0_20 = arith.constant 0 : index
    %c0_21 = arith.constant 0 : index
    %21 = vector.load %arg4[%c2_19, %c0_20, %c0_21] : memref<3x16x1xf32, #tpu.memory_space<vmem>>, vector<1x16x1xf32>
    %22 = vector.shape_cast %21 : vector<1x16x1xf32> to vector<16x1xf32>
    %23 = vector.broadcast %22 : vector<16x1xf32> to vector<16x16xf32>
    %24 = arith.mulf %20, %23 : vector<16x16xf32>
    %25 = arith.addf %16, %24 : vector<16x16xf32>
    %c0_22 = arith.constant 0 : index
    %c0_23 = arith.constant 0 : index
    %26 = vector.load %arg6[%c0_22, %c0_23] : memref<1x16xf32, #tpu.memory_space<vmem>>, vector<1x16xf32>
    %27 = vector.broadcast %26 : vector<1x16xf32> to vector<16x16xf32>
    %28 = arith.addf %25, %27 : vector<16x16xf32>
    %cst_24 = arith.constant dense<0.000000e+00> : vector<1x16xf32>
    %29 = tpu.matmul %0, %28, %cst_24 {dimension_numbers = #tpu.dot_dimension_numbers<[1], [0], [0], [1], [0, 0, 1, 1], [], []>} : vector<1x16xf32>, vector<16x16xf32>, vector<1x16xf32> -> vector<1x16xf32>
    %cst_25 = arith.constant dense<0.000000e+00> : vector<1x8xf32>
    %30 = tpu.matmul %29, %2, %cst_25 {dimension_numbers = #tpu.dot_dimension_numbers<[1], [0], [0], [1], [0, 0, 1, 1], [], []>} : vector<1x16xf32>, vector<16x8xf32>, vector<1x8xf32> -> vector<1x8xf32>
    %cst_26 = arith.constant 3.125000e-02 : f32
    %31 = vector.broadcast %cst_26 : f32 to vector<1x8xf32>
    %32 = arith.mulf %30, %31 : vector<1x8xf32>
    %cst_27 = arith.constant dense<0.000000e+00> : vector<1x16xf32>
    %33 = tpu.matmul %32, %1, %cst_27 {dimension_numbers = #tpu.dot_dimension_numbers<[1], [0], [0], [1], [0, 0, 1, 1], [], []>} : vector<1x8xf32>, vector<8x16xf32>, vector<1x16xf32> -> vector<1x16xf32>
    %34 = vector.shape_cast %28 : vector<16x16xf32> to vector<1x16x16xf32>
    %35 = vector.shape_cast %33 : vector<1x16xf32> to vector<1x1x16xf32>
    %36 = vector.broadcast %35 : vector<1x1x16xf32> to vector<1x16x16xf32>
    %37 = arith.subf %34, %36 : vector<1x16x16xf32>
    %38 = vector.shape_cast %37 : vector<1x16x16xf32> to vector<16x16xf32>
    %39 = arith.mulf %38, %38 : vector<16x16xf32>
    %cst_28 = arith.constant dense<0.000000e+00> : vector<1x16xf32>
    %40 = tpu.matmul %0, %39, %cst_28 {dimension_numbers = #tpu.dot_dimension_numbers<[1], [0], [0], [1], [0, 0, 1, 1], [], []>} : vector<1x16xf32>, vector<16x16xf32>, vector<1x16xf32> -> vector<1x16xf32>
    %cst_29 = arith.constant dense<0.000000e+00> : vector<1x8xf32>
    %41 = tpu.matmul %40, %2, %cst_29 {dimension_numbers = #tpu.dot_dimension_numbers<[1], [0], [0], [1], [0, 0, 1, 1], [], []>} : vector<1x16xf32>, vector<16x8xf32>, vector<1x8xf32> -> vector<1x8xf32>
    %cst_30 = arith.constant 3.125000e-02 : f32
    %42 = vector.broadcast %cst_30 : f32 to vector<1x8xf32>
    %43 = arith.mulf %41, %42 : vector<1x8xf32>
    %cst_31 = arith.constant 9.99999974E-6 : f32
    %44 = vector.broadcast %cst_31 : f32 to vector<1x8xf32>
    %45 = arith.addf %43, %44 : vector<1x8xf32>
    %46 = math.rsqrt %45 : vector<1x8xf32>
    %cst_32 = arith.constant dense<0.000000e+00> : vector<1x16xf32>
    %47 = tpu.matmul %46, %1, %cst_32 {dimension_numbers = #tpu.dot_dimension_numbers<[1], [0], [0], [1], [0, 0, 1, 1], [], []>} : vector<1x8xf32>, vector<8x16xf32>, vector<1x16xf32> -> vector<1x16xf32>
    %48 = vector.shape_cast %47 : vector<1x16xf32> to vector<1x1x16xf32>
    %49 = vector.broadcast %48 : vector<1x1x16xf32> to vector<1x16x16xf32>
    %50 = arith.mulf %37, %49 : vector<1x16x16xf32>
    %c0_33 = arith.constant 0 : index
    %c0_34 = arith.constant 0 : index
    %51 = vector.load %arg7[%c0_33, %c0_34] : memref<1x16xf32, #tpu.memory_space<vmem>>, vector<1x16xf32>
    %52 = vector.shape_cast %51 : vector<1x16xf32> to vector<1x1x16xf32>
    %53 = vector.broadcast %52 : vector<1x1x16xf32> to vector<1x16x16xf32>
    %54 = arith.mulf %50, %53 : vector<1x16x16xf32>
    %c0_35 = arith.constant 0 : index
    %c0_36 = arith.constant 0 : index
    %55 = vector.load %arg8[%c0_35, %c0_36] : memref<1x16xf32, #tpu.memory_space<vmem>>, vector<1x16xf32>
    %56 = vector.shape_cast %55 : vector<1x16xf32> to vector<1x1x16xf32>
    %57 = vector.broadcast %56 : vector<1x1x16xf32> to vector<1x16x16xf32>
    %58 = arith.addf %54, %57 : vector<1x16x16xf32>
    %cst_37 = arith.constant 2.000000e+01 : f32
    %59 = vector.broadcast %cst_37 : f32 to vector<1x16x16xf32>
    %60 = arith.minimumf %58, %59 : vector<1x16x16xf32>
    %61 = math.exp %60 : vector<1x16x16xf32>
    %cst_38 = arith.constant 2.000000e+00 : f32
    %62 = vector.broadcast %cst_38 : f32 to vector<1x16x16xf32>
    %63 = arith.addf %61, %62 : vector<1x16x16xf32>
    %64 = arith.mulf %61, %63 : vector<1x16x16xf32>
    %65 = arith.mulf %58, %64 : vector<1x16x16xf32>
    %cst_39 = arith.constant 2.000000e+00 : f32
    %66 = vector.broadcast %cst_39 : f32 to vector<1x16x16xf32>
    %67 = arith.addf %64, %66 : vector<1x16x16xf32>
    %68 = tpu.reciprocal %67 {approx = true} : vector<1x16x16xf32> -> vector<1x16x16xf32>
    %69 = arith.mulf %65, %68 : vector<1x16x16xf32>
    %c0_40 = arith.constant 0 : index
    %c0_41 = arith.constant 0 : index
    %c0_42 = arith.constant 0 : index
    %70 = vector.load %arg2[%c0_40, %c0_41, %c0_42] : memref<1x1x16xf32, #tpu.memory_space<vmem>>, vector<1x1x16xf32>
    %71 = vector.shape_cast %70 : vector<1x1x16xf32> to vector<1x16xf32>
    %72 = vector.shape_cast %71 : vector<1x16xf32> to vector<1x1x16xf32>
    %73 = vector.broadcast %72 : vector<1x1x16xf32> to vector<1x16x16xf32>
    %74 = arith.mulf %73, %69 : vector<1x16x16xf32>
    %c0_43 = arith.constant 0 : index
    %c0_44 = arith.constant 0 : index
    %c0_45 = arith.constant 0 : index
    %75 = vector.load %arg3[%c0_43, %c0_44, %c0_45] : memref<1x1x16xf32, #tpu.memory_space<vmem>>, vector<1x1x16xf32>
    %76 = vector.shape_cast %75 : vector<1x1x16xf32> to vector<1x16xf32>
    %77 = vector.shape_cast %76 : vector<1x16xf32> to vector<1x1x16xf32>
    %78 = vector.broadcast %77 : vector<1x1x16xf32> to vector<1x16x16xf32>
    %79 = arith.addf %74, %78 : vector<1x16x16xf32>
    %80 = vector.shape_cast %79 : vector<1x16x16xf32> to vector<16x16xf32>
    %81 = arith.truncf %80 : vector<16x16xf32> to vector<16x16xbf16>
    %c1_46 = arith.constant 1 : index
    %c0_47 = arith.constant 0 : index
    %c0_48 = arith.constant 0 : index
    %82 = vector.load %arg9[%c1_46, %c0_47, %c0_48] : memref<3x16x16xbf16, #tpu.memory_space<vmem>>, vector<1x16x16xbf16>
    %83 = vector.shape_cast %82 : vector<1x16x16xbf16> to vector<16x16xbf16>
    %cst_49 = arith.constant dense<0.000000e+00> : vector<16x16xf32>
    %84 = tpu.matmul %81, %83, %cst_49 {dimension_numbers = #tpu.dot_dimension_numbers<[1], [0], [0], [1], [0, 0, 1, 1], [], []>} : vector<16x16xbf16>, vector<16x16xbf16>, vector<16x16xf32> -> vector<16x16xf32>
    %c0_50 = arith.constant 0 : index
    %c0_51 = arith.constant 0 : index
    %c0_52 = arith.constant 0 : index
    %85 = vector.load %arg9[%c0_50, %c0_51, %c0_52] : memref<3x16x16xbf16, #tpu.memory_space<vmem>>, vector<1x16x16xbf16>
    %86 = vector.shape_cast %85 : vector<1x16x16xbf16> to vector<16x16xbf16>
    %cst_53 = arith.constant dense<0.000000e+00> : vector<16x16xf32>
    %87 = tpu.matmul %81, %86, %cst_53 {dimension_numbers = #tpu.dot_dimension_numbers<[1], [0], [0], [1], [0, 0, 1, 1], [], []>} : vector<16x16xbf16>, vector<16x16xbf16>, vector<16x16xf32> -> vector<16x16xf32>
    %c1_i32_54 = arith.constant 1 : i32
    %88 = tpu.dynamic_rotate %87 by %c1_i32_54 dim 0 : vector<16x16xf32>, i32 -> vector<16x16xf32>
    %c0_55 = arith.constant 0 : index
    %c0_56 = arith.constant 0 : index
    %c0_57 = arith.constant 0 : index
    %89 = vector.load %arg4[%c0_55, %c0_56, %c0_57] : memref<3x16x1xf32, #tpu.memory_space<vmem>>, vector<1x16x1xf32>
    %90 = vector.shape_cast %89 : vector<1x16x1xf32> to vector<16x1xf32>
    %91 = vector.broadcast %90 : vector<16x1xf32> to vector<16x16xf32>
    %92 = arith.mulf %88, %91 : vector<16x16xf32>
    %93 = arith.addf %84, %92 : vector<16x16xf32>
    %c2_58 = arith.constant 2 : index
    %c0_59 = arith.constant 0 : index
    %c0_60 = arith.constant 0 : index
    %94 = vector.load %arg9[%c2_58, %c0_59, %c0_60] : memref<3x16x16xbf16, #tpu.memory_space<vmem>>, vector<1x16x16xbf16>
    %95 = vector.shape_cast %94 : vector<1x16x16xbf16> to vector<16x16xbf16>
    %cst_61 = arith.constant dense<0.000000e+00> : vector<16x16xf32>
    %96 = tpu.matmul %81, %95, %cst_61 {dimension_numbers = #tpu.dot_dimension_numbers<[1], [0], [0], [1], [0, 0, 1, 1], [], []>} : vector<16x16xbf16>, vector<16x16xbf16>, vector<16x16xf32> -> vector<16x16xf32>
    %c15_i32_62 = arith.constant 15 : i32
    %97 = tpu.dynamic_rotate %96 by %c15_i32_62 dim 0 : vector<16x16xf32>, i32 -> vector<16x16xf32>
    %c2_63 = arith.constant 2 : index
    %c0_64 = arith.constant 0 : index
    %c0_65 = arith.constant 0 : index
    %98 = vector.load %arg4[%c2_63, %c0_64, %c0_65] : memref<3x16x1xf32, #tpu.memory_space<vmem>>, vector<1x16x1xf32>
    %99 = vector.shape_cast %98 : vector<1x16x1xf32> to vector<16x1xf32>
    %100 = vector.broadcast %99 : vector<16x1xf32> to vector<16x16xf32>
    %101 = arith.mulf %97, %100 : vector<16x16xf32>
    %102 = arith.addf %93, %101 : vector<16x16xf32>
    %c0_66 = arith.constant 0 : index
    %c0_67 = arith.constant 0 : index
    %103 = vector.load %arg10[%c0_66, %c0_67] : memref<1x16xf32, #tpu.memory_space<vmem>>, vector<1x16xf32>
    %104 = vector.broadcast %103 : vector<1x16xf32> to vector<16x16xf32>
    %105 = arith.addf %102, %104 : vector<16x16xf32>
    %cst_68 = arith.constant dense<0.000000e+00> : vector<1x16xf32>
    %106 = tpu.matmul %0, %105, %cst_68 {dimension_numbers = #tpu.dot_dimension_numbers<[1], [0], [0], [1], [0, 0, 1, 1], [], []>} : vector<1x16xf32>, vector<16x16xf32>, vector<1x16xf32> -> vector<1x16xf32>
    %cst_69 = arith.constant dense<0.000000e+00> : vector<1x8xf32>
    %107 = tpu.matmul %106, %2, %cst_69 {dimension_numbers = #tpu.dot_dimension_numbers<[1], [0], [0], [1], [0, 0, 1, 1], [], []>} : vector<1x16xf32>, vector<16x8xf32>, vector<1x8xf32> -> vector<1x8xf32>
    %cst_70 = arith.constant 3.125000e-02 : f32
    %108 = vector.broadcast %cst_70 : f32 to vector<1x8xf32>
    %109 = arith.mulf %107, %108 : vector<1x8xf32>
    %cst_71 = arith.constant dense<0.000000e+00> : vector<1x16xf32>
    %110 = tpu.matmul %109, %1, %cst_71 {dimension_numbers = #tpu.dot_dimension_numbers<[1], [0], [0], [1], [0, 0, 1, 1], [], []>} : vector<1x8xf32>, vector<8x16xf32>, vector<1x16xf32> -> vector<1x16xf32>
    %111 = vector.shape_cast %105 : vector<16x16xf32> to vector<1x16x16xf32>
    %112 = vector.shape_cast %110 : vector<1x16xf32> to vector<1x1x16xf32>
    %113 = vector.broadcast %112 : vector<1x1x16xf32> to vector<1x16x16xf32>
    %114 = arith.subf %111, %113 : vector<1x16x16xf32>
    %115 = vector.shape_cast %114 : vector<1x16x16xf32> to vector<16x16xf32>
    %116 = arith.mulf %115, %115 : vector<16x16xf32>
    %cst_72 = arith.constant dense<0.000000e+00> : vector<1x16xf32>
    %117 = tpu.matmul %0, %116, %cst_72 {dimension_numbers = #tpu.dot_dimension_numbers<[1], [0], [0], [1], [0, 0, 1, 1], [], []>} : vector<1x16xf32>, vector<16x16xf32>, vector<1x16xf32> -> vector<1x16xf32>
    %cst_73 = arith.constant dense<0.000000e+00> : vector<1x8xf32>
    %118 = tpu.matmul %117, %2, %cst_73 {dimension_numbers = #tpu.dot_dimension_numbers<[1], [0], [0], [1], [0, 0, 1, 1], [], []>} : vector<1x16xf32>, vector<16x8xf32>, vector<1x8xf32> -> vector<1x8xf32>
    %cst_74 = arith.constant 3.125000e-02 : f32
    %119 = vector.broadcast %cst_74 : f32 to vector<1x8xf32>
    %120 = arith.mulf %118, %119 : vector<1x8xf32>
    %cst_75 = arith.constant 9.99999974E-6 : f32
    %121 = vector.broadcast %cst_75 : f32 to vector<1x8xf32>
    %122 = arith.addf %120, %121 : vector<1x8xf32>
    %123 = math.rsqrt %122 : vector<1x8xf32>
    %cst_76 = arith.constant dense<0.000000e+00> : vector<1x16xf32>
    %124 = tpu.matmul %123, %1, %cst_76 {dimension_numbers = #tpu.dot_dimension_numbers<[1], [0], [0], [1], [0, 0, 1, 1], [], []>} : vector<1x8xf32>, vector<8x16xf32>, vector<1x16xf32> -> vector<1x16xf32>
    %125 = vector.shape_cast %124 : vector<1x16xf32> to vector<1x1x16xf32>
    %126 = vector.broadcast %125 : vector<1x1x16xf32> to vector<1x16x16xf32>
    %127 = arith.mulf %114, %126 : vector<1x16x16xf32>
    %c0_77 = arith.constant 0 : index
    %c0_78 = arith.constant 0 : index
    %128 = vector.load %arg11[%c0_77, %c0_78] : memref<1x16xf32, #tpu.memory_space<vmem>>, vector<1x16xf32>
    %129 = vector.shape_cast %128 : vector<1x16xf32> to vector<1x1x16xf32>
    %130 = vector.broadcast %129 : vector<1x1x16xf32> to vector<1x16x16xf32>
    %131 = arith.mulf %127, %130 : vector<1x16x16xf32>
    %c0_79 = arith.constant 0 : index
    %c0_80 = arith.constant 0 : index
    %132 = vector.load %arg12[%c0_79, %c0_80] : memref<1x16xf32, #tpu.memory_space<vmem>>, vector<1x16xf32>
    %133 = vector.shape_cast %132 : vector<1x16xf32> to vector<1x1x16xf32>
    %134 = vector.broadcast %133 : vector<1x1x16xf32> to vector<1x16x16xf32>
    %135 = arith.addf %131, %134 : vector<1x16x16xf32>
    %cst_81 = arith.constant 2.000000e+01 : f32
    %136 = vector.broadcast %cst_81 : f32 to vector<1x16x16xf32>
    %137 = arith.minimumf %135, %136 : vector<1x16x16xf32>
    %138 = math.exp %137 : vector<1x16x16xf32>
    %cst_82 = arith.constant 2.000000e+00 : f32
    %139 = vector.broadcast %cst_82 : f32 to vector<1x16x16xf32>
    %140 = arith.addf %138, %139 : vector<1x16x16xf32>
    %141 = arith.mulf %138, %140 : vector<1x16x16xf32>
    %142 = arith.mulf %135, %141 : vector<1x16x16xf32>
    %cst_83 = arith.constant 2.000000e+00 : f32
    %143 = vector.broadcast %cst_83 : f32 to vector<1x16x16xf32>
    %144 = arith.addf %141, %143 : vector<1x16x16xf32>
    %145 = tpu.reciprocal %144 {approx = true} : vector<1x16x16xf32> -> vector<1x16x16xf32>
    %146 = arith.mulf %142, %145 : vector<1x16x16xf32>
    %c0_84 = arith.constant 0 : index
    %c0_85 = arith.constant 0 : index
    %147 = vector.load %arg16[%c0_84, %c0_85] : memref<4x16xbf16, #tpu.memory_space<vmem>>, vector<4x16xbf16>
    %cst_86 = arith.constant dense<0.000000e+00> : vector<16x16xf32>
    %148 = tpu.matmul %4, %147, %cst_86 {dimension_numbers = #tpu.dot_dimension_numbers<[1], [0], [0], [1], [0, 0, 1, 1], [], []>} : vector<16x4xbf16>, vector<4x16xbf16>, vector<16x16xf32> -> vector<16x16xf32>
    %c0_87 = arith.constant 0 : index
    %c0_88 = arith.constant 0 : index
    %149 = vector.load %arg17[%c0_87, %c0_88] : memref<1x16xf32, #tpu.memory_space<vmem>>, vector<1x16xf32>
    %150 = vector.broadcast %149 : vector<1x16xf32> to vector<16x16xf32>
    %151 = arith.addf %148, %150 : vector<16x16xf32>
    %152 = vector.shape_cast %146 : vector<1x16x16xf32> to vector<16x16xf32>
    %153 = arith.addf %152, %151 : vector<16x16xf32>
    %c0_89 = arith.constant 0 : index
    %c0_90 = arith.constant 0 : index
    %154 = vector.load %arg18[%c0_89, %c0_90] : memref<16x16xf32, #tpu.memory_space<vmem>>, vector<16x16xf32>
    tpu.vector_store %arg18[%c0_89, %c0_90], %153 {strides = array<i32>} : memref<16x16xf32, #tpu.memory_space<vmem>>, vector<16x16xf32>,
    return
  }
  func.func @transform_0(%arg0: i32) -> (i32, i32) {
    %c0_i32 = arith.constant 0 : i32
    %c0_i32_0 = arith.constant 0 : i32
    return %arg0, %c0_i32 : i32, i32
  }
  func.func @transform_1(%arg0: i32) -> (i32, i32, i32) {
    %c0_i32 = arith.constant 0 : i32
    %c0_i32_0 = arith.constant 0 : i32
    %c0_i32_1 = arith.constant 0 : i32
    return %arg0, %c0_i32, %c0_i32_0 : i32, i32, i32
  }
  func.func @transform_2(%arg0: i32) -> (i32, i32, i32) {
    %c0_i32 = arith.constant 0 : i32
    %c0_i32_0 = arith.constant 0 : i32
    %c0_i32_1 = arith.constant 0 : i32
    return %arg0, %c0_i32, %c0_i32_0 : i32, i32, i32
  }
  func.func @transform_3(%arg0: i32) -> (i32, i32, i32) {
    %c0_i32 = arith.constant 0 : i32
    %c0_i32_0 = arith.constant 0 : i32
    %c0_i32_1 = arith.constant 0 : i32
    %c0_i32_2 = arith.constant 0 : i32
    return %c0_i32, %c0_i32_0, %c0_i32_1 : i32, i32, i32
  }
  func.func @transform_4(%arg0: i32) -> (i32, i32, i32) {
    %c0_i32 = arith.constant 0 : i32
    %c0_i32_0 = arith.constant 0 : i32
    %c0_i32_1 = arith.constant 0 : i32
    %c0_i32_2 = arith.constant 0 : i32
    return %c0_i32, %c0_i32_0, %c0_i32_1 : i32, i32, i32
  }
  func.func @transform_5(%arg0: i32) -> (i32, i32) {
    %c0_i32 = arith.constant 0 : i32
    %c0_i32_0 = arith.constant 0 : i32
    %c0_i32_1 = arith.constant 0 : i32
    return %c0_i32, %c0_i32_0 : i32, i32
  }
  func.func @transform_6(%arg0: i32) -> (i32, i32) {
    %c0_i32 = arith.constant 0 : i32
    %c0_i32_0 = arith.constant 0 : i32
    %c0_i32_1 = arith.constant 0 : i32
    return %c0_i32, %c0_i32_0 : i32, i32
  }
  func.func @transform_7(%arg0: i32) -> (i32, i32) {
    %c0_i32 = arith.constant 0 : i32
    %c0_i32_0 = arith.constant 0 : i32
    %c0_i32_1 = arith.constant 0 : i32
    return %c0_i32, %c0_i32_0 : i32, i32
  }
  func.func @transform_8(%arg0: i32) -> (i32, i32, i32) {
    %c0_i32 = arith.constant 0 : i32
    %c0_i32_0 = arith.constant 0 : i32
    %c0_i32_1 = arith.constant 0 : i32
    %c0_i32_2 = arith.constant 0 : i32
    return %c0_i32, %c0_i32_0, %c0_i32_1 : i32, i32, i32
  }
  func.func @transform_9(%arg0: i32) -> (i32, i32) {
    %c0_i32 = arith.constant 0 : i32
    %c0_i32_0 = arith.constant 0 : i32
    %c0_i32_1 = arith.constant 0 : i32
    return %c0_i32, %c0_i32_0 : i32, i32
  }
  func.func @transform_10(%arg0: i32) -> (i32, i32) {
    %c0_i32 = arith.constant 0 : i32
    %c0_i32_0 = arith.constant 0 : i32
    %c0_i32_1 = arith.constant 0 : i32
    return %c0_i32, %c0_i32_0 : i32, i32
  }
  func.func @transform_11(%arg0: i32) -> (i32, i32) {
    %c0_i32 = arith.constant 0 : i32
    %c0_i32_0 = arith.constant 0 : i32
    %c0_i32_1 = arith.constant 0 : i32
    return %c0_i32, %c0_i32_0 : i32, i32
  }
  func.func @transform_12(%arg0: i32) -> (i32, i32) {
    %c0_i32 = arith.constant 0 : i32
    %c0_i32_0 = arith.constant 0 : i32
    %c0_i32_1 = arith.constant 0 : i32
    return %c0_i32, %c0_i32_0 : i32, i32
  }
  func.func @transform_13(%arg0: i32) -> (i32, i32) {
    %c0_i32 = arith.constant 0 : i32
    %c0_i32_0 = arith.constant 0 : i32
    %c0_i32_1 = arith.constant 0 : i32
    return %c0_i32, %c0_i32_0 : i32, i32
  }
  func.func @transform_14(%arg0: i32) -> (i32, i32) {
    %c0_i32 = arith.constant 0 : i32
    %c0_i32_0 = arith.constant 0 : i32
    %c0_i32_1 = arith.constant 0 : i32
    return %c0_i32, %c0_i32_0 : i32, i32
  }
  func.func @transform_15(%arg0: i32) -> (i32, i32) {
    %c0_i32 = arith.constant 0 : i32
    %c0_i32_0 = arith.constant 0 : i32
    %c0_i32_1 = arith.constant 0 : i32
    return %c0_i32, %c0_i32_0 : i32, i32
  }
  func.func @transform_16(%arg0: i32) -> (i32, i32) {
    %c0_i32 = arith.constant 0 : i32
    %c0_i32_0 = arith.constant 0 : i32
    %c0_i32_1 = arith.constant 0 : i32
    return %c0_i32, %c0_i32_0 : i32, i32
  }
  func.func @transform_17(%arg0: i32) -> (i32, i32) {
    %c0_i32 = arith.constant 0 : i32
    %c0_i32_0 = arith.constant 0 : i32
    return %arg0, %c0_i32 : i32, i32
  }
}

</mosaic_0001>

<bundles_post_ra>
// kernel: tpu_custom_call.1
= control target key start
LH: loop header
LB: loop body
LE: loop exit
PB: predicated region body
PF: predicated region fallthrough
CT: control target
= control target key end

     0   :  { %s1465_s24 = smov 0   ;;  %s1671_s0 = inlined_call_operand.vmem [shape: f32[32,4], index: 0, kind: input, shape index: {}]   ;;  %s1672_s1 = inlined_call_operand.vmem [shape: f32[2,1,16], index: 1, kind: input, shape index: {}]   ;;  %s1673_s2 = inlined_call_operand.vmem [shape: f32[2,1,16], index: 2, kind: input, shape index: {}]   ;;  %s1674_s3 = inlined_call_operand.vmem [shape: f32[3,16,1], index: 3, kind: input, shape index: {}]   ;;  %s1675_s4 = inlined_call_operand.vmem [shape: bf16[3,4,16], index: 4, kind: input, shape index: {}]   ;;  %s1676_s5 = inlined_call_operand.vmem [shape: f32[1,16], index: 5, kind: input, shape index: {}]   ;;  %s1677_s6 = inlined_call_operand.vmem [shape: f32[1,16], index: 6, kind: input, shape index: {}]   ;;  %s1678_s7 = inlined_call_operand.vmem [shape: f32[1,16], index: 7, kind: input, shape index: {}]   ;;  %s1679_s8 = inlined_call_operand.vmem [shape: bf16[3,16,16], index: 8, kind: input, shape index: {}]   ;;  %s1680_s9 = inlined_call_operand.vmem [shape: f32[1,16], index: 9, kind: input, shape index: {}]   ;;  %s1681_s10 = inlined_call_operand.vmem [shape: f32[1,16], index: 10, kind: input, shape index: {}]   ;;  %s1682_s11 = inlined_call_operand.vmem [shape: f32[1,16], index: 11, kind: input, shape index: {}]   ;;  %s1683_s12 = inlined_call_operand.vmem [shape: f32[8,16], index: 12, kind: input, shape index: {}]   ;;  %s1684_s13 = inlined_call_operand.vmem [shape: f32[16,8], index: 13, kind: input, shape index: {}]   ;;  %s1685_s14 = inlined_call_operand.vmem [shape: f32[1,16], index: 14, kind: input, shape index: {}]   ;;  %s1686_s15 = inlined_call_operand.vmem [shape: bf16[4,16], index: 15, kind: input, shape index: {}]   ;;  %s1687_s16 = inlined_call_operand.vmem [shape: f32[1,16], index: 16, kind: input, shape index: {}]   ;;  %s1688_s17 = inlined_call_operand.vmem [shape: f32[32,16], index: 17, kind: output, shape index: {}]  }
   0x1   :  { %1691 = sst [smem:[#allocation2_spill]] %s1671_s0 }
   0x2   :  { %1692 = sst [smem:[#allocation3_spill]] %s1672_s1 }
   0x3   :  { %1693 = sst [smem:[#allocation4_spill]] %s1674_s3 }
   0x4 LB: > { %s1471_s25 = sadd.s32 4294967295, %s1372_s24   ;;  %p1277_p0 = scmp.ge.s32.totalorder %s1372_s24, 1  ;;  %s1372_s24 = sphi %s1465_s24, %s27_s24  }
   0x5   : > { %p504_p1 = scmp.lt.s32.totalorder %s1372_s24, 3 }
   0x7   : > { %p505_p2 = pnand %p1277_p0, %p504_p1 }
   0x8   : > { %s1278_s0 = sshll.u32 (!%p505_p2), %s1471_s25, 1  ;;  %s1694_s3 = sld [smem:[#allocation4_spill]] (!%p505_p2) }
   0x9   : > { %508 = sbr.rel (%p505_p2) target bundleno = 2031 (0x7ef), region = 88  ;;  %p563_p3 = scmp.lt.s32.totalorder (!%p505_p2), %s1278_s0, 3 }
   0xa   : > { %s1695_s27 = sld [smem:[#allocation2_spill]] (!%p505_p2)  ;;  %p568_p4 = scmp.lt.s32.totalorder (!%p505_p2), %s1471_s25, 1 }
   0xb   : > { %s1696_s20 = sld [smem:[#allocation3_spill]] (!%p505_p2) }
   0xe   : > { %v590_v0 = vld [vmem:[%s1675_s4] sm:$0x3]  ;;  %vm595_vm0 = vcmask 1041408   ;;  %v1285_v1 = vld [vmem:[%s1675_s4 + $0x4] sm:$0x3]  ;;  %v621_v6 = vld [vmem:[%s1694_s3 + $0x8] sm:$0xff]  ;;  %v615_v16 = vlaneseq }
   0xf   : > { %v597_v2 = vsel %vm595_vm0, %v590_v0, 0  ;;  %v654_v3 = vsel %vm595_vm0, %v1285_v1, 0  ;;  %v1282_v4 = vld [vmem:[%s1675_s4 + $0x2] sm:$0x3]  ;;  %v1288_v7 = vld [vmem:[%s1694_s3 + $0x28] sm:$0xff]  ;;  %s1699_s0 = smov (!%p563_p3, %s1278_s0), 3 }
  0x10   : > { %606 = vmatpush.bf16.msra.mxu0 %v597_v2  ;;  %663 = vmatpush.bf16.msra.mxu2 %v654_v3  ;;  %v635_v5 = vsel %vm595_vm0, %v1282_v4, 0  ;;  %v1374_v8 = vmov 0   ;;  %s1690_s22 = sshll.u32 %s1699_s0, 3  ;;  %vm591_vm1 = vcmask 31744   ;;  %v620_v12 = vld [vmem:[%s1694_s3] sm:$0xff]  ;;  %v1519_v14 = vld [vmem:[%s1684_s13 + $0x8] sm:$0xff] }
  0x11   : > { %644 = vmatpush.bf16.msra.mxu1 %v635_v5  ;;  %1335 = vset.pattern.permute.xlu0 %v1374_v8  ;;  %s566_s28 = scalar_lea.vmem %s1695_s27, %s1690_s22  ;;  %v1287_v13 = vld [vmem:[%s1694_s3 + $0x20] sm:$0xff]  ;;  %v1524_v18 = vshrl.u32 %v615_v16, 7  ;;  %vm698_vm4 = vcmask 130048   ;;  %vm746_vm5 = vcmask 64512   ;;  %s1701_s25 = smov (!%p568_p4, %s1471_s25), 1 }
  0x12   : > { %629 = vperm.xlu0 %1335, %v621_v6   ;;  %1336 = vset.pattern.permute.xlu1 %v1374_v8  ;;  %v585_v9 = vld [vmem:[%s566_s28] sm:$0xff]  ;;  %v586_v10 = vld [vmem:[%s566_s28 + $0x8] sm:$0xff]  ;;  %s570_s21 = scalar_lea.vmem %s1696_s20, %s1701_s25  ;;  %s573_s27 = scalar_lea.vmem %s1673_s2, %s1701_s25 }
  0x13   : > { %685 = vperm.xlu1 %1336, %v1288_v7   ;;  %v1502_v11 = vpack.c.bf16 %v586_v10, %v585_v9  ;;  %vm617_vm2 = vcmp.lt.s32.totalorder %v1524_v18, 1  ;;  %vm672_vm3 = vcmp.lt.s32.totalorder %v1524_v18, 7  ;;  %v1337_v40 = vld [vmem:[%s1676_s5] ss:$0 sm:$0xff]  ;;  %v1323_v9 = vld [vmem:[%s1679_s8 + $0x8] sm:$0xff]  ;;  %v1325_v10 = vld [vmem:[%s1679_s8 + $0x10] sm:$0xff] }
  0x14   : > { %812 = vmatpush.msrb.mxu2 %v1519_v14  ;;  %v1552_v46 = vld [vmem:[%s1685_s14] sm:$0x1]  ;;  %s1697_s22 = sshll.u32 %s1699_s0, 3 }
  0x15   : > { %1283 = vmatmul.msk.bf16.vlgmr.msra.gmra.mxu0 %vm591_vm1, %v1502_v11  ;;  %1286 = vmatmul.msk.bf16.vlgmr.msra.gmra.mxu2 %vm591_vm1, %v1502_v11  ;;  %v1560_v47 = vld [vmem:[%s1684_s13] sm:$0xff]  ;;  %s578_s25 = scalar_lea.vmem %s1688_s17, %s1697_s22 }
  0x16   : > { %1284 = vmatmul.msk.bf16.vlgmr.msra.gmra.mxu1 %vm591_vm1, %v1502_v11  ;;  %813 = vmatpush.msrb.mxu2 %v1560_v47  ;;  %v1568_v49 = vld [vmem:[%s1683_s12] sm:$0xff] }
  0x17   : > { %765 = vmatpush.msrb.mxu1 %v1568_v49  ;;  %v1338_v7 = vld [vmem:[%s1677_s6] ss:$0 sm:$0xff] }
  0x18   : > { %v1324_v8 = vld [vmem:[%s1679_s8] sm:$0xff]  ;;  %969 = vmatpush.bf16.msra.mxu2 %v1325_v10 }
  0x19   : > { %920 = vmatpush.bf16.msrb.mxu0 %v1324_v8 }
  0x1a   : > { %624 = vperm.xlu0 %1335, %v620_v12  }
  0x1b   : > { %680 = vperm.xlu1 %1336, %v1287_v13  }
  0x1d   : > { %1052 = vmatpush.msra.mxu0 %v1568_v49 }
  0x84   : > { %v1522_v17 = vpop.permute.xlu0 %629 }
  0x85   : > { %v1526_v21 = vpop.permute.xlu1 %685 }
  0x8c   : > { %v1533_v27 = vpop.permute.xlu0 %624 }
  0x8d   : > { %v1538_v34 = vpop.permute.xlu1 %680 }
  0x92   : > { %v608_v15 = vpop.f32.mrf.mxu0 }
  0x93   : > { %v646_v20 = vpop.f32.mrf.mxu1  ;;  %v613_v23 = vrot.slane %v608_v15, 7  ;;  %v1339_v15 = vld [vmem:[%s1678_s7] ss:$0 sm:$0xff] }
  0x98   : > { %v665_v19 = vpop.f32.mrf.mxu2 }
  0x99   : > { %v670_v31 = vrot.slane %v665_v19, 1 }
  0x9a   : > { %v610_v22 = vpop.f32.mrf.mxu0 }
  0x9b   : > { %v614_v24 = vrot.slane %v610_v22, 7  ;;  %v648_v33 = vpop.f32.mrf.mxu1 }
  0x9d   : > { %v619_v25 = vsel %vm617_vm2, %v614_v24, %v613_v23  ;;  %v618_v26 = vsel %vm617_vm2, %v613_v23, %v614_v24 }
  0x9e   : > { %v632_v28 = vmul.f32 %v1533_v27, %v619_v25  ;;  %v633_v29 = vmul.f32 %v1522_v17, %v618_v26 }
  0xa0   : > { %v667_v30 = vpop.f32.mrf.mxu2  ;;  %v647_v37 = vadd.f32 %v646_v20, %v632_v28  ;;  %v649_v38 = vadd.f32 %v648_v33, %v633_v29 }
  0xa1   : > { %v671_v32 = vrot.slane %v667_v30, 1 }
  0xa3   : > { %v673_v35 = vsel %vm672_vm3, %v670_v31, %v671_v32  ;;  %v674_v36 = vsel %vm672_vm3, %v671_v32, %v670_v31 }
  0xa4   : > { %v689_v39 = vmul.f32 %v1526_v21, %v674_v36  ;;  %v688_v41 = vmul.f32 %v1538_v34, %v673_v35 }
  0xa6   : > { %v691_v42 = vadd.f32 %v689_v39, %v649_v38  ;;  %v690_v43 = vadd.f32 %v688_v41, %v647_v37  ;;  %v1340_v38 = vld [vmem:[%s570_s21] ss:$0 sm:$0xff] }
  0xa8   : > { %v697_v44 = vadd.f32 %v1337_v40, %v691_v42  ;;  %v696_v45 = vadd.f32 %v1337_v40, %v690_v43  ;;  %v1341_v43 = vld [vmem:[%s573_s27] ss:$0 sm:$0xff] }
  0xaa   : > { %716 = vmatpush.msra.mxu3 %v697_v44 }
  0xac   : > { %717 = vmatpush.msra.mxu3 %v696_v45 }
  0xad   : > { %1289 = vmatmul.msk.f32.vlgmr.msra.gmra.mxu3 %vm698_vm4, %v1552_v46 }
  0xae   : > { %739 = vmatpush.msrb.mxu3 %v1519_v14 }
  0xb0   : > { %740 = vmatpush.msrb.mxu3 %v1560_v47 }
  0xb2   : > { %848 = vmatpush.msra.mxu3 %v1568_v49 }
 0x130   : > { %v719_v48 = vpop.f32.mrf.mxu3 }
 0x131   : > { %1290 = vmatmul.msk.f32.vlgmr.msrb.gmra.mxu3 %vm698_vm4, %v719_v48 }
 0x1b4   : > { %v742_v50 = vpop.f32.mrf.mxu3 }
 0x1b5   : > { %v745_v51 = vmul.f32 0.03125, %v742_v50 }
 0x1b7   : > { %1291 = vmatmul.msk.f32.vlgmr.msrb.gmra.mxu1 %vm746_vm5, %v745_v51 }
 0x234   : > { %v767_v52 = vpop.f32.mrf.mxu1 }
 0x235   : > { %v770_v53 = vperm.slane %v767_v52, 0 }
 0x237   : > { %v771_v54 = vsub.f32 %v696_v45, %v770_v53  ;;  %v772_v55 = vsub.f32 %v697_v44, %v770_v53 }
 0x239   : > { %v774_v56 = vmul.f32 %v772_v55, %v772_v55  ;;  %v773_v57 = vmul.f32 %v771_v54, %v771_v54 }
 0x23b   : > { %789 = vmatpush.msra.mxu1 %v774_v56 }
 0x23d   : > { %790 = vmatpush.msra.mxu1 %v773_v57 }
 0x23e   : > { %1292 = vmatmul.msk.f32.vlgmr.msra.gmra.mxu1 %vm698_vm4, %v1552_v46 }
 0x23f   : > { %946 = vmatpush.bf16.msrb.mxu1 %v1323_v9 }
 0x2bb   : > { %v792_v58 = vpop.f32.mrf.mxu1 }
 0x2bc   : > { %1293 = vmatmul.msk.f32.vlgmr.msrb.gmra.mxu2 %vm698_vm4, %v792_v58 }
 0x2bd   : > { %1099 = vmatpush.msrb.mxu2 %v1519_v14 }
 0x2bf   : > { %1100 = vmatpush.msrb.mxu2 %v1560_v47 }
 0x33f   : > { %v815_v59 = vpop.f32.mrf.mxu2 }
 0x340   : > { %v818_v60 = vmul.f32 0.03125, %v815_v59 }
 0x342   : > { %v819_v61 = vadd.f32 1e-05, %v818_v60 }
 0x344   : > { %1346 = vrsqrt.f32 %v819_v61  ;;  %vm826_vm7 = vweird.f32 %v819_v61 }
 0x34a   : > { %v1347_v62 = vpop.eup %1346 }
 0x34b   : > { %v821_v63 = vmul.f32 %v1347_v62, %v819_v61  ;;  %vm827_vm6 = vweird.f32 %v1347_v62 }
 0x34c   : > { %vm828_vm8 = vmor %vm826_vm7, %vm827_vm6 }
 0x34d   : > { %v822_v0 = vmul.f32 %v1347_v62, %v821_v63 }
 0x34f   : > { %v823_v1 = vmul.f32 0.5, %v822_v0 }
 0x351   : > { %v824_v2 = vsub.f32 1.5, %v823_v1 }
 0x353   : > { %v825_v3 = vmul.f32 %v1347_v62, %v824_v2 }
 0x355   : > { %v829_v4 = vsel %vm828_vm8, %v1347_v62, %v825_v3 }
 0x356   : > { %1294 = vmatmul.msk.f32.vlgmr.msra.gmra.mxu3 %vm746_vm5, %v829_v4 }
 0x3d9   : > { %v850_v5 = vpop.f32.mrf.mxu3 }
 0x3da   : > { %v853_v6 = vperm.slane %v850_v5, 0 }
 0x3dc   : > { %v854_v12 = vmul.f32 %v853_v6, %v771_v54  ;;  %v855_v13 = vmul.f32 %v853_v6, %v772_v55 }
 0x3de   : > { %v860_v16 = vmul.f32 %v1338_v7, %v854_v12  ;;  %v861_v19 = vmul.f32 %v1338_v7, %v855_v13 }
 0x3e0   : > { %v866_v20 = vadd.f32 %v1339_v15, %v860_v16  ;;  %v867_v22 = vadd.f32 %v1339_v15, %v861_v19 }
 0x3e2   : > { %v868_v23 = vmin.f32 %v866_v20, 20.0  ;;  %v869_v24 = vmin.f32 %v867_v22, 20.0 }
 0x3e4   : > { %v870_v25 = vmul.f32 1.442695, %v868_v23  ;;  %v872_v26 = vmul.f32 1.442695, %v869_v24 }
 0x3e6   : > { %1348 = vpow2.f32 %v870_v25 }
 0x3e7   : > { %1350 = vpow2.f32 %v872_v26 }
 0x3ec   : > { %v1349_v28 = vpop.eup %1348 }
 0x3ed   : > { %v1351_v29 = vpop.eup %1350  ;;  %v874_v30 = vadd.f32 2.0, %v1349_v28 }
 0x3ee   : > { %v875_v31 = vadd.f32 2.0, %v1351_v29 }
 0x3ef   : > { %v876_v32 = vmul.f32 %v1349_v28, %v874_v30 }
 0x3f0   : > { %v877_v33 = vmul.f32 %v1351_v29, %v875_v31 }
 0x3f1   : > { %v880_v35 = vadd.f32 2.0, %v876_v32  ;;  %v878_v37 = vmul.f32 %v876_v32, %v866_v20 }
 0x3f2   : > { %v881_v36 = vadd.f32 2.0, %v877_v33  ;;  %v879_v40 = vmul.f32 %v877_v33, %v867_v22 }
 0x3f3   : > { %1352 = vrcp.f32 %v880_v35 }
 0x3f4   : > { %1354 = vrcp.f32 %v881_v36 }
 0x3f9   : > { %v1353_v39 = vpop.eup %1352 }
 0x3fa   : > { %v1355_v41 = vpop.eup %1354  ;;  %v884_v42 = vmul.f32 %v1353_v39, %v878_v37 }
 0x3fb   : > { %v885_v44 = vmul.f32 %v1355_v41, %v879_v40 }
 0x3fc   : > { %v890_v45 = vmul.f32 %v1340_v38, %v884_v42 }
 0x3fd   : > { %v891_v48 = vmul.f32 %v1340_v38, %v885_v44  ;;  %v1344_v38 = vld [vmem:[%s1682_s11] ss:$0 sm:$0xff] }
 0x3fe   : > { %v896_v50 = vadd.f32 %v1341_v43, %v890_v45 }
 0x3ff   : > { %v897_v51 = vadd.f32 %v1341_v43, %v891_v48 }
 0x401   : > { %v898_v52 = vpack.c.bf16 %v897_v51, %v896_v50 }
 0x403   : > { %1301 = vmatmul.msk.bf16.vlgmr.msrb.gmra.mxu0 %vm698_vm4, %v898_v52  ;;  %1306 = vmatmul.msk.bf16.vlgmr.msrb.gmra.mxu1 %vm698_vm4, %v898_v52 }
 0x404   : > { %1313 = vmatmul.msk.bf16.vlgmr.msra.gmra.mxu2 %vm698_vm4, %v898_v52 }
 0x480   : > { %v922_v53 = vpop.f32.mrf.mxu0  ;;  %v948_v55 = vpop.f32.mrf.mxu1 }
 0x481   : > { %v927_v58 = vrot.slane %v922_v53, 7 }
 0x487   : > { %v971_v54 = vpop.f32.mrf.mxu2 }
 0x488   : > { %v924_v56 = vpop.f32.mrf.mxu0  ;;  %v976_v0 = vrot.slane %v971_v54, 1  ;;  %v950_v2 = vpop.f32.mrf.mxu1 }
 0x489   : > { %v928_v57 = vrot.slane %v924_v56, 7 }
 0x48b   : > { %v930_v59 = vsel %vm617_vm2, %v928_v57, %v927_v58  ;;  %v929_v60 = vsel %vm617_vm2, %v927_v58, %v928_v57 }
 0x48c   : > { %v931_v61 = vmul.f32 %v930_v59, %v1533_v27  ;;  %v932_v62 = vmul.f32 %v929_v60, %v1522_v17  ;;  %v1342_v27 = vld [vmem:[%s1680_s9] ss:$0 sm:$0xff] }
 0x48d   : > { %v1345_v59 = vld [vmem:[%s1687_s16] ss:$0 sm:$0xff] }
 0x48e   : > { %v951_v5 = vadd.f32 %v950_v2, %v932_v62  ;;  %v949_v17 = vadd.f32 %v948_v55, %v931_v61 }
 0x48f   : > { %v973_v63 = vpop.f32.mrf.mxu2 }
 0x490   : > { %v977_v1 = vrot.slane %v973_v63, 1 }
 0x492   : > { %v978_v3 = vsel %vm672_vm3, %v976_v0, %v977_v1  ;;  %v979_v4 = vsel %vm672_vm3, %v977_v1, %v976_v0 }
 0x493   : > { %v980_v6 = vmul.f32 %v978_v3, %v1538_v34  ;;  %v981_v7 = vmul.f32 %v979_v4, %v1526_v21 }
 0x495   : > { %v983_v8 = vadd.f32 %v981_v7, %v951_v5  ;;  %v982_v9 = vadd.f32 %v980_v6, %v949_v17 }
 0x497   : > { %v989_v10 = vadd.f32 %v1342_v27, %v983_v8  ;;  %v988_v12 = vadd.f32 %v1342_v27, %v982_v9 }
 0x499   : > { %1004 = vmatpush.msrb.mxu3 %v989_v10 }
 0x49b   : > { %1005 = vmatpush.msrb.mxu3 %v988_v12 }
 0x49c   : > { %1314 = vmatmul.msk.f32.vlgmr.msrb.gmra.mxu3 %vm698_vm4, %v1552_v46 }
 0x49d   : > { %1027 = vmatpush.msra.mxu3 %v1519_v14 }
 0x49f   : > { %1028 = vmatpush.msra.mxu3 %v1560_v47  ;;  %v1173_v47 = vld [vmem:[%s1686_s15] sm:$0x3] }
 0x4a1   : > { %1135 = vmatpush.msrb.mxu3 %v1568_v49  ;;  %v1179_v49 = vsel %vm595_vm0, %v1173_v47, 0 }
 0x4a2   : > { %1188 = vmatpush.bf16.msrb.mxu0 %v1179_v49 }
 0x51f   : > { %v1007_v18 = vpop.f32.mrf.mxu3 }
 0x520   : > { %1315 = vmatmul.msk.f32.vlgmr.msra.gmra.mxu3 %vm698_vm4, %v1007_v18 }
 0x5a3   : > { %v1030_v21 = vpop.f32.mrf.mxu3 }
 0x5a4   : > { %v1033_v34 = vmul.f32 0.03125, %v1030_v21 }
 0x5a6   : > { %1316 = vmatmul.msk.f32.vlgmr.msra.gmra.mxu0 %vm746_vm5, %v1033_v34 }
 0x5ae   : > { %1320 = vmatmul.msk.bf16.vlgmr.msrb.gmra.mxu0 %vm591_vm1, %v1502_v11  ;;  %v1343_v11 = vld [vmem:[%s1681_s10] ss:$0 sm:$0xff] }
 0x623   : > { %v1054_v13 = vpop.f32.mrf.mxu0 }
 0x624   : > { %v1057_v15 = vperm.slane %v1054_v13, 0 }
 0x626   : > { %v1058_v16 = vsub.f32 %v988_v12, %v1057_v15  ;;  %v1059_v19 = vsub.f32 %v989_v10, %v1057_v15 }
 0x628   : > { %v1061_v20 = vmul.f32 %v1059_v19, %v1059_v19  ;;  %v1060_v22 = vmul.f32 %v1058_v16, %v1058_v16 }
 0x62a   : > { %1076 = vmatpush.msra.mxu1 %v1061_v20 }
 0x62b   : > { %v1190_v53 = vpop.f32.mrf.mxu0 }
 0x62c   : > { %1077 = vmatpush.msra.mxu1 %v1060_v22  ;;  %v1191_v2 = vadd.f32 %v1345_v59, %v1190_v53 }
 0x62d   : > { %1317 = vmatmul.msk.f32.vlgmr.msra.gmra.mxu1 %vm698_vm4, %v1552_v46 }
 0x633   : > { %v1192_v61 = vpop.f32.mrf.mxu0 }
 0x634   : > { %v1193_v4 = vadd.f32 %v1345_v59, %v1192_v61 }
 0x6aa   : > { %v1079_v14 = vpop.f32.mrf.mxu1 }
 0x6ab   : > { %1318 = vmatmul.msk.f32.vlgmr.msrb.gmra.mxu2 %vm698_vm4, %v1079_v14 }
 0x72e   : > { %v1102_v23 = vpop.f32.mrf.mxu2 }
 0x72f   : > { %v1105_v24 = vmul.f32 0.03125, %v1102_v23 }
 0x731   : > { %v1106_v25 = vadd.f32 1e-05, %v1105_v24 }
 0x733   : > { %1356 = vrsqrt.f32 %v1106_v25  ;;  %vm1113_vm10 = vweird.f32 %v1106_v25 }
 0x739   : > { %v1357_v26 = vpop.eup %1356 }
 0x73a   : > { %v1108_v28 = vmul.f32 %v1357_v26, %v1106_v25  ;;  %vm1114_vm9 = vweird.f32 %v1357_v26 }
 0x73b   : > { %vm1115_vm11 = vmor %vm1113_vm10, %vm1114_vm9 }
 0x73c   : > { %v1109_v46 = vmul.f32 %v1357_v26, %v1108_v28 }
 0x73e   : > { %v1110_v29 = vmul.f32 0.5, %v1109_v46 }
 0x740   : > { %v1111_v30 = vsub.f32 1.5, %v1110_v29 }
 0x742   : > { %v1112_v31 = vmul.f32 %v1357_v26, %v1111_v30 }
 0x744   : > { %v1116_v32 = vsel %vm1115_vm11, %v1357_v26, %v1112_v31 }
 0x745   : > { %1319 = vmatmul.msk.f32.vlgmr.msrb.gmra.mxu3 %vm746_vm5, %v1116_v32 }
 0x7c8   : > { %v1137_v33 = vpop.f32.mrf.mxu3 }
 0x7c9   : > { %v1140_v35 = vperm.slane %v1137_v33, 0 }
 0x7cb   : > { %v1141_v36 = vmul.f32 %v1140_v35, %v1058_v16  ;;  %v1142_v37 = vmul.f32 %v1140_v35, %v1059_v19 }
 0x7cd   : > { %v1147_v39 = vmul.f32 %v1343_v11, %v1141_v36  ;;  %v1148_v40 = vmul.f32 %v1343_v11, %v1142_v37 }
 0x7cf   : > { %v1153_v41 = vadd.f32 %v1344_v38, %v1147_v39  ;;  %v1154_v42 = vadd.f32 %v1344_v38, %v1148_v40 }
 0x7d1   : > { %v1155_v43 = vmin.f32 %v1153_v41, 20.0  ;;  %v1156_v44 = vmin.f32 %v1154_v42, 20.0 }
 0x7d3   : > { %v1157_v45 = vmul.f32 1.442695, %v1155_v43  ;;  %v1159_v48 = vmul.f32 1.442695, %v1156_v44 }
 0x7d5   : > { %1358 = vpow2.f32 %v1157_v45 }
 0x7d6   : > { %1360 = vpow2.f32 %v1159_v48 }
 0x7db   : > { %v1359_v50 = vpop.eup %1358 }
 0x7dc   : > { %v1361_v51 = vpop.eup %1360  ;;  %v1161_v52 = vadd.f32 2.0, %v1359_v50 }
 0x7dd   : > { %v1162_v54 = vadd.f32 2.0, %v1361_v51 }
 0x7de   : > { %v1163_v55 = vmul.f32 %v1359_v50, %v1161_v52 }
 0x7df   : > { %v1164_v56 = vmul.f32 %v1361_v51, %v1162_v54 }
 0x7e0   : > { %v1167_v57 = vadd.f32 2.0, %v1163_v55  ;;  %v1165_v60 = vmul.f32 %v1163_v55, %v1153_v41 }
 0x7e1   : > { %v1168_v58 = vadd.f32 2.0, %v1164_v56  ;;  %v1166_v63 = vmul.f32 %v1164_v56, %v1154_v42 }
 0x7e2   : > { %1362 = vrcp.f32 %v1167_v57 }
 0x7e3   : > { %1364 = vrcp.f32 %v1168_v58 }
 0x7e8   : > { %v1363_v62 = vpop.eup %1362 }
 0x7e9   : > { %v1365_v0 = vpop.eup %1364  ;;  %v1171_v1 = vmul.f32 %v1363_v62, %v1165_v60 }
 0x7ea   : > { %v1172_v3 = vmul.f32 %v1365_v0, %v1166_v63 }
 0x7eb   : > { %v1195_v5 = vadd.f32 %v1191_v2, %v1171_v1 }
 0x7ec   : > { %v1196_v6 = vadd.f32 %v1193_v4, %v1172_v3 }
 0x7ed   : > { %1197 = vst.msk [vmem:[%s578_s25] sm:$0xff] %vm698_vm4, %v1195_v5 }
 0x7ee   : > { %1198 = vst.msk [vmem:[%s578_s25 + $0x8] sm:$0xff] %vm698_vm4, %v1196_v6 }
 0x7ef PF: > { %s27_s24 = sadd.s32 1, %s1372_s24  }
 0x7f0   : > { %p24_p5 = scmp.ge.s32.totalorder %s27_s24, 4  }
 0x7f2   :  { %26 = sbr.rel (!%p24_p5) target bundleno = 4 (0x4), region = 129 }

// kernel: tpu_custom_call.1
= control target key start
LH: loop header
LB: loop body
LE: loop exit
PB: predicated region body
PF: predicated region fallthrough
CT: control target
= control target key end

     0   :  { %s1465_s24 = smov 0   ;;  %s1671_s0 = inlined_call_operand.vmem [shape: f32[32,4], index: 0, kind: input, shape index: {}]   ;;  %s1672_s1 = inlined_call_operand.vmem [shape: f32[2,1,16], index: 1, kind: input, shape index: {}]   ;;  %s1673_s2 = inlined_call_operand.vmem [shape: f32[2,1,16], index: 2, kind: input, shape index: {}]   ;;  %s1674_s3 = inlined_call_operand.vmem [shape: f32[3,16,1], index: 3, kind: input, shape index: {}]   ;;  %s1675_s4 = inlined_call_operand.vmem [shape: bf16[3,4,16], index: 4, kind: input, shape index: {}]   ;;  %s1676_s5 = inlined_call_operand.vmem [shape: f32[1,16], index: 5, kind: input, shape index: {}]   ;;  %s1677_s6 = inlined_call_operand.vmem [shape: f32[1,16], index: 6, kind: input, shape index: {}]   ;;  %s1678_s7 = inlined_call_operand.vmem [shape: f32[1,16], index: 7, kind: input, shape index: {}]   ;;  %s1679_s8 = inlined_call_operand.vmem [shape: bf16[3,16,16], index: 8, kind: input, shape index: {}]   ;;  %s1680_s9 = inlined_call_operand.vmem [shape: f32[1,16], index: 9, kind: input, shape index: {}]   ;;  %s1681_s10 = inlined_call_operand.vmem [shape: f32[1,16], index: 10, kind: input, shape index: {}]   ;;  %s1682_s11 = inlined_call_operand.vmem [shape: f32[1,16], index: 11, kind: input, shape index: {}]   ;;  %s1683_s12 = inlined_call_operand.vmem [shape: f32[8,16], index: 12, kind: input, shape index: {}]   ;;  %s1684_s13 = inlined_call_operand.vmem [shape: f32[16,8], index: 13, kind: input, shape index: {}]   ;;  %s1685_s14 = inlined_call_operand.vmem [shape: f32[1,16], index: 14, kind: input, shape index: {}]   ;;  %s1686_s15 = inlined_call_operand.vmem [shape: bf16[4,16], index: 15, kind: input, shape index: {}]   ;;  %s1687_s16 = inlined_call_operand.vmem [shape: f32[1,16], index: 16, kind: input, shape index: {}]   ;;  %s1688_s17 = inlined_call_operand.vmem [shape: f32[32,16], index: 17, kind: output, shape index: {}]  }
   0x1   :  { %1691 = sst [smem:[#allocation2_spill]] %s1671_s0 }
   0x2   :  { %1692 = sst [smem:[#allocation3_spill]] %s1672_s1 }
   0x3   :  { %1693 = sst [smem:[#allocation4_spill]] %s1674_s3 }
   0x4 LB: > { %s1471_s25 = sadd.s32 4294967295, %s1372_s24   ;;  %p1277_p0 = scmp.ge.s32.totalorder %s1372_s24, 1  ;;  %s1372_s24 = sphi %s1465_s24, %s27_s24  }
   0x5   : > { %p504_p1 = scmp.lt.s32.totalorder %s1372_s24, 3 }
   0x7   : > { %p505_p2 = pnand %p1277_p0, %p504_p1 }
   0x8   : > { %s1278_s0 = sshll.u32 (!%p505_p2), %s1471_s25, 1  ;;  %s1694_s3 = sld [smem:[#allocation4_spill]] (!%p505_p2) }
   0x9   : > { %508 = sbr.rel (%p505_p2) target bundleno = 2031 (0x7ef), region = 88  ;;  %p563_p3 = scmp.lt.s32.totalorder (!%p505_p2), %s1278_s0, 3 }
   0xa   : > { %s1695_s27 = sld [smem:[#allocation2_spill]] (!%p505_p2)  ;;  %p568_p4 = scmp.lt.s32.totalorder (!%p505_p2), %s1471_s25, 1 }
   0xb   : > { %s1696_s20 = sld [smem:[#allocation3_spill]] (!%p505_p2) }
   0xe   : > { %v590_v0 = vld [vmem:[%s1675_s4] sm:$0x3]  ;;  %vm595_vm0 = vcmask 1041408   ;;  %v1285_v1 = vld [vmem:[%s1675_s4 + $0x4] sm:$0x3]  ;;  %v621_v6 = vld [vmem:[%s1694_s3 + $0x8] sm:$0xff]  ;;  %v615_v16 = vlaneseq }
   0xf   : > { %v597_v2 = vsel %vm595_vm0, %v590_v0, 0  ;;  %v654_v3 = vsel %vm595_vm0, %v1285_v1, 0  ;;  %v1282_v4 = vld [vmem:[%s1675_s4 + $0x2] sm:$0x3]  ;;  %v1288_v7 = vld [vmem:[%s1694_s3 + $0x28] sm:$0xff]  ;;  %s1699_s0 = smov (!%p563_p3, %s1278_s0), 3 }
  0x10   : > { %606 = vmatpush.bf16.msra.mxu0 %v597_v2  ;;  %663 = vmatpush.bf16.msra.mxu2 %v654_v3  ;;  %v635_v5 = vsel %vm595_vm0, %v1282_v4, 0  ;;  %v1374_v8 = vmov 0   ;;  %s1690_s22 = sshll.u32 %s1699_s0, 3  ;;  %vm591_vm1 = vcmask 31744   ;;  %v620_v12 = vld [vmem:[%s1694_s3] sm:$0xff]  ;;  %v1519_v14 = vld [vmem:[%s1684_s13 + $0x8] sm:$0xff] }
  0x11   : > { %644 = vmatpush.bf16.msra.mxu1 %v635_v5  ;;  %1335 = vset.pattern.permute.xlu0 %v1374_v8  ;;  %s566_s28 = scalar_lea.vmem %s1695_s27, %s1690_s22  ;;  %v1287_v13 = vld [vmem:[%s1694_s3 + $0x20] sm:$0xff]  ;;  %v1524_v18 = vshrl.u32 %v615_v16, 7  ;;  %vm698_vm4 = vcmask 130048   ;;  %vm746_vm5 = vcmask 64512   ;;  %s1701_s25 = smov (!%p568_p4, %s1471_s25), 1 }
  0x12   : > { %629 = vperm.xlu0 %1335, %v621_v6   ;;  %1336 = vset.pattern.permute.xlu1 %v1374_v8  ;;  %v585_v9 = vld [vmem:[%s566_s28] sm:$0xff]  ;;  %v586_v10 = vld [vmem:[%s566_s28 + $0x8] sm:$0xff]  ;;  %s570_s21 = scalar_lea.vmem %s1696_s20, %s1701_s25  ;;  %s573_s27 = scalar_lea.vmem %s1673_s2, %s1701_s25 }
  0x13   : > { %685 = vperm.xlu1 %1336, %v1288_v7   ;;  %v1502_v11 = vpack.c.bf16 %v586_v10, %v585_v9  ;;  %vm617_vm2 = vcmp.lt.s32.totalorder %v1524_v18, 1  ;;  %vm672_vm3 = vcmp.lt.s32.totalorder %v1524_v18, 7  ;;  %v1337_v40 = vld [vmem:[%s1676_s5] ss:$0 sm:$0xff]  ;;  %v1323_v9 = vld [vmem:[%s1679_s8 + $0x8] sm:$0xff]  ;;  %v1325_v10 = vld [vmem:[%s1679_s8 + $0x10] sm:$0xff] }
  0x14   : > { %812 = vmatpush.msrb.mxu2 %v1519_v14  ;;  %v1552_v46 = vld [vmem:[%s1685_s14] sm:$0x1]  ;;  %s1697_s22 = sshll.u32 %s1699_s0, 3 }
  0x15   : > { %1283 = vmatmul.msk.bf16.vlgmr.msra.gmra.mxu0 %vm591_vm1, %v1502_v11  ;;  %1286 = vmatmul.msk.bf16.vlgmr.msra.gmra.mxu2 %vm591_vm1, %v1502_v11  ;;  %v1560_v47 = vld [vmem:[%s1684_s13] sm:$0xff]  ;;  %s578_s25 = scalar_lea.vmem %s1688_s17, %s1697_s22 }
  0x16   : > { %1284 = vmatmul.msk.bf16.vlgmr.msra.gmra.mxu1 %vm591_vm1, %v1502_v11  ;;  %813 = vmatpush.msrb.mxu2 %v1560_v47  ;;  %v1568_v49 = vld [vmem:[%s1683_s12] sm:$0xff] }
  0x17   : > { %765 = vmatpush.msrb.mxu1 %v1568_v49  ;;  %v1338_v7 = vld [vmem:[%s1677_s6] ss:$0 sm:$0xff] }
  0x18   : > { %v1324_v8 = vld [vmem:[%s1679_s8] sm:$0xff]  ;;  %969 = vmatpush.bf16.msra.mxu2 %v1325_v10 }
  0x19   : > { %920 = vmatpush.bf16.msrb.mxu0 %v1324_v8 }
  0x1a   : > { %624 = vperm.xlu0 %1335, %v620_v12  }
  0x1b   : > { %680 = vperm.xlu1 %1336, %v1287_v13  }
  0x1d   : > { %1052 = vmatpush.msra.mxu0 %v1568_v49 }
  0x84   : > { %v1522_v17 = vpop.permute.xlu0 %629 }
  0x85   : > { %v1526_v21 = vpop.permute.xlu1 %685 }
  0x8c   : > { %v1533_v27 = vpop.permute.xlu0 %624 }
  0x8d   : > { %v1538_v34 = vpop.permute.xlu1 %680 }
  0x92   : > { %v608_v15 = vpop.f32.mrf.mxu0 }
  0x93   : > { %v646_v20 = vpop.f32.mrf.mxu1  ;;  %v613_v23 = vrot.slane %v608_v15, 7  ;;  %v1339_v15 = vld [vmem:[%s1678_s7] ss:$0 sm:$0xff] }
  0x98   : > { %v665_v19 = vpop.f32.mrf.mxu2 }
  0x99   : > { %v670_v31 = vrot.slane %v665_v19, 1 }
  0x9a   : > { %v610_v22 = vpop.f32.mrf.mxu0 }
  0x9b   : > { %v614_v24 = vrot.slane %v610_v22, 7  ;;  %v648_v33 = vpop.f32.mrf.mxu1 }
  0x9d   : > { %v619_v25 = vsel %vm617_vm2, %v614_v24, %v613_v23  ;;  %v618_v26 = vsel %vm617_vm2, %v613_v23, %v614_v24 }
  0x9e   : > { %v632_v28 = vmul.f32 %v1533_v27, %v619_v25  ;;  %v633_v29 = vmul.f32 %v1522_v17, %v618_v26 }
  0xa0   : > { %v667_v30 = vpop.f32.mrf.mxu2  ;;  %v647_v37 = vadd.f32 %v646_v20, %v632_v28  ;;  %v649_v38 = vadd.f32 %v648_v33, %v633_v29 }
  0xa1   : > { %v671_v32 = vrot.slane %v667_v30, 1 }
  0xa3   : > { %v673_v35 = vsel %vm672_vm3, %v670_v31, %v671_v32  ;;  %v674_v36 = vsel %vm672_vm3, %v671_v32, %v670_v31 }
  0xa4   : > { %v689_v39 = vmul.f32 %v1526_v21, %v674_v36  ;;  %v688_v41 = vmul.f32 %v1538_v34, %v673_v35 }
  0xa6   : > { %v691_v42 = vadd.f32 %v689_v39, %v649_v38  ;;  %v690_v43 = vadd.f32 %v688_v41, %v647_v37  ;;  %v1340_v38 = vld [vmem:[%s570_s21] ss:$0 sm:$0xff] }
  0xa8   : > { %v697_v44 = vadd.f32 %v1337_v40, %v691_v42  ;;  %v696_v45 = vadd.f32 %v1337_v40, %v690_v43  ;;  %v1341_v43 = vld [vmem:[%s573_s27] ss:$0 sm:$0xff] }
  0xaa   : > { %716 = vmatpush.msra.mxu3 %v697_v44 }
  0xac   : > { %717 = vmatpush.msra.mxu3 %v696_v45 }
  0xad   : > { %1289 = vmatmul.msk.f32.vlgmr.msra.gmra.mxu3 %vm698_vm4, %v1552_v46 }
  0xae   : > { %739 = vmatpush.msrb.mxu3 %v1519_v14 }
  0xb0   : > { %740 = vmatpush.msrb.mxu3 %v1560_v47 }
  0xb2   : > { %848 = vmatpush.msra.mxu3 %v1568_v49 }
 0x130   : > { %v719_v48 = vpop.f32.mrf.mxu3 }
 0x131   : > { %1290 = vmatmul.msk.f32.vlgmr.msrb.gmra.mxu3 %vm698_vm4, %v719_v48 }
 0x1b4   : > { %v742_v50 = vpop.f32.mrf.mxu3 }
 0x1b5   : > { %v745_v51 = vmul.f32 0.03125, %v742_v50 }
 0x1b7   : > { %1291 = vmatmul.msk.f32.vlgmr.msrb.gmra.mxu1 %vm746_vm5, %v745_v51 }
 0x234   : > { %v767_v52 = vpop.f32.mrf.mxu1 }
 0x235   : > { %v770_v53 = vperm.slane %v767_v52, 0 }
 0x237   : > { %v771_v54 = vsub.f32 %v696_v45, %v770_v53  ;;  %v772_v55 = vsub.f32 %v697_v44, %v770_v53 }
 0x239   : > { %v774_v56 = vmul.f32 %v772_v55, %v772_v55  ;;  %v773_v57 = vmul.f32 %v771_v54, %v771_v54 }
 0x23b   : > { %789 = vmatpush.msra.mxu1 %v774_v56 }
 0x23d   : > { %790 = vmatpush.msra.mxu1 %v773_v57 }
 0x23e   : > { %1292 = vmatmul.msk.f32.vlgmr.msra.gmra.mxu1 %vm698_vm4, %v1552_v46 }
 0x23f   : > { %946 = vmatpush.bf16.msrb.mxu1 %v1323_v9 }
 0x2bb   : > { %v792_v58 = vpop.f32.mrf.mxu1 }
 0x2bc   : > { %1293 = vmatmul.msk.f32.vlgmr.msrb.gmra.mxu2 %vm698_vm4, %v792_v58 }
 0x2bd   : > { %1099 = vmatpush.msrb.mxu2 %v1519_v14 }
 0x2bf   : > { %1100 = vmatpush.msrb.mxu2 %v1560_v47 }
 0x33f   : > { %v815_v59 = vpop.f32.mrf.mxu2 }
 0x340   : > { %v818_v60 = vmul.f32 0.03125, %v815_v59 }
 0x342   : > { %v819_v61 = vadd.f32 1e-05, %v818_v60 }
 0x344   : > { %1346 = vrsqrt.f32 %v819_v61  ;;  %vm826_vm7 = vweird.f32 %v819_v61 }
 0x34a   : > { %v1347_v62 = vpop.eup %1346 }
 0x34b   : > { %v821_v63 = vmul.f32 %v1347_v62, %v819_v61  ;;  %vm827_vm6 = vweird.f32 %v1347_v62 }
 0x34c   : > { %vm828_vm8 = vmor %vm826_vm7, %vm827_vm6 }
 0x34d   : > { %v822_v0 = vmul.f32 %v1347_v62, %v821_v63 }
 0x34f   : > { %v823_v1 = vmul.f32 0.5, %v822_v0 }
 0x351   : > { %v824_v2 = vsub.f32 1.5, %v823_v1 }
 0x353   : > { %v825_v3 = vmul.f32 %v1347_v62, %v824_v2 }
 0x355   : > { %v829_v4 = vsel %vm828_vm8, %v1347_v62, %v825_v3 }
 0x356   : > { %1294 = vmatmul.msk.f32.vlgmr.msra.gmra.mxu3 %vm746_vm5, %v829_v4 }
 0x3d9   : > { %v850_v5 = vpop.f32.mrf.mxu3 }
 0x3da   : > { %v853_v6 = vperm.slane %v850_v5, 0 }
 0x3dc   : > { %v854_v12 = vmul.f32 %v853_v6, %v771_v54  ;;  %v855_v13 = vmul.f32 %v853_v6, %v772_v55 }
 0x3de   : > { %v860_v16 = vmul.f32 %v1338_v7, %v854_v12  ;;  %v861_v19 = vmul.f32 %v1338_v7, %v855_v13 }
 0x3e0   : > { %v866_v20 = vadd.f32 %v1339_v15, %v860_v16  ;;  %v867_v22 = vadd.f32 %v1339_v15, %v861_v19 }
 0x3e2   : > { %v868_v23 = vmin.f32 %v866_v20, 20.0  ;;  %v869_v24 = vmin.f32 %v867_v22, 20.0 }
 0x3e4   : > { %v870_v25 = vmul.f32 1.442695, %v868_v23  ;;  %v872_v26 = vmul.f32 1.442695, %v869_v24 }
 0x3e6   : > { %1348 = vpow2.f32 %v870_v25 }
 0x3e7   : > { %1350 = vpow2.f32 %v872_v26 }
 0x3ec   : > { %v1349_v28 = vpop.eup %1348 }
 0x3ed   : > { %v1351_v29 = vpop.eup %1350  ;;  %v874_v30 = vadd.f32 2.0, %v1349_v28 }
 0x3ee   : > { %v875_v31 = vadd.f32 2.0, %v1351_v29 }
 0x3ef   : > { %v876_v32 = vmul.f32 %v1349_v28, %v874_v30 }
 0x3f0   : > { %v877_v33 = vmul.f32 %v1351_v29, %v875_v31 }
 0x3f1   : > { %v880_v35 = vadd.f32 2.0, %v876_v32  ;;  %v878_v37 = vmul.f32 %v876_v32, %v866_v20 }
 0x3f2   : > { %v881_v36 = vadd.f32 2.0, %v877_v33  ;;  %v879_v40 = vmul.f32 %v877_v33, %v867_v22 }
 0x3f3   : > { %1352 = vrcp.f32 %v880_v35 }
 0x3f4   : > { %1354 = vrcp.f32 %v881_v36 }
 0x3f9   : > { %v1353_v39 = vpop.eup %1352 }
 0x3fa   : > { %v1355_v41 = vpop.eup %1354  ;;  %v884_v42 = vmul.f32 %v1353_v39, %v878_v37 }
 0x3fb   : > { %v885_v44 = vmul.f32 %v1355_v41, %v879_v40 }
 0x3fc   : > { %v890_v45 = vmul.f32 %v1340_v38, %v884_v42 }
 0x3fd   : > { %v891_v48 = vmul.f32 %v1340_v38, %v885_v44  ;;  %v1344_v38 = vld [vmem:[%s1682_s11] ss:$0 sm:$0xff] }
 0x3fe   : > { %v896_v50 = vadd.f32 %v1341_v43, %v890_v45 }
 0x3ff   : > { %v897_v51 = vadd.f32 %v1341_v43, %v891_v48 }
 0x401   : > { %v898_v52 = vpack.c.bf16 %v897_v51, %v896_v50 }
 0x403   : > { %1301 = vmatmul.msk.bf16.vlgmr.msrb.gmra.mxu0 %vm698_vm4, %v898_v52  ;;  %1306 = vmatmul.msk.bf16.vlgmr.msrb.gmra.mxu1 %vm698_vm4, %v898_v52 }
 0x404   : > { %1313 = vmatmul.msk.bf16.vlgmr.msra.gmra.mxu2 %vm698_vm4, %v898_v52 }
 0x480   : > { %v922_v53 = vpop.f32.mrf.mxu0  ;;  %v948_v55 = vpop.f32.mrf.mxu1 }
 0x481   : > { %v927_v58 = vrot.slane %v922_v53, 7 }
 0x487   : > { %v971_v54 = vpop.f32.mrf.mxu2 }
 0x488   : > { %v924_v56 = vpop.f32.mrf.mxu0  ;;  %v976_v0 = vrot.slane %v971_v54, 1  ;;  %v950_v2 = vpop.f32.mrf.mxu1 }
 0x489   : > { %v928_v57 = vrot.slane %v924_v56, 7 }
 0x48b   : > { %v930_v59 = vsel %vm617_vm2, %v928_v57, %v927_v58  ;;  %v929_v60 = vsel %vm617_vm2, %v927_v58, %v928_v57 }
 0x48c   : > { %v931_v61 = vmul.f32 %v930_v59, %v1533_v27  ;;  %v932_v62 = vmul.f32 %v929_v60, %v1522_v17  ;;  %v1342_v27 = vld [vmem:[%s1680_s9] ss:$0 sm:$0xff] }
 0x48d   : > { %v1345_v59 = vld [vmem:[%s1687_s16] ss:$0 sm:$0xff] }
 0x48e   : > { %v951_v5 = vadd.f32 %v950_v2, %v932_v62  ;;  %v949_v17 = vadd.f32 %v948_v55, %v931_v61 }
 0x48f   : > { %v973_v63 = vpop.f32.mrf.mxu2 }
 0x490   : > { %v977_v1 = vrot.slane %v973_v63, 1 }
 0x492   : > { %v978_v3 = vsel %vm672_vm3, %v976_v0, %v977_v1  ;;  %v979_v4 = vsel %vm672_vm3, %v977_v1, %v976_v0 }
 0x493   : > { %v980_v6 = vmul.f32 %v978_v3, %v1538_v34  ;;  %v981_v7 = vmul.f32 %v979_v4, %v1526_v21 }
 0x495   : > { %v983_v8 = vadd.f32 %v981_v7, %v951_v5  ;;  %v982_v9 = vadd.f32 %v980_v6, %v949_v17 }
 0x497   : > { %v989_v10 = vadd.f32 %v1342_v27, %v983_v8  ;;  %v988_v12 = vadd.f32 %v1342_v27, %v982_v9 }
 0x499   : > { %1004 = vmatpush.msrb.mxu3 %v989_v10 }
 0x49b   : > { %1005 = vmatpush.msrb.mxu3 %v988_v12 }
 0x49c   : > { %1314 = vmatmul.msk.f32.vlgmr.msrb.gmra.mxu3 %vm698_vm4, %v1552_v46 }
 0x49d   : > { %1027 = vmatpush.msra.mxu3 %v1519_v14 }
 0x49f   : > { %1028 = vmatpush.msra.mxu3 %v1560_v47  ;;  %v1173_v47 = vld [vmem:[%s1686_s15] sm:$0x3] }
 0x4a1   : > { %1135 = vmatpush.msrb.mxu3 %v1568_v49  ;;  %v1179_v49 = vsel %vm595_vm0, %v1173_v47, 0 }
 0x4a2   : > { %1188 = vmatpush.bf16.msrb.mxu0 %v1179_v49 }
 0x51f   : > { %v1007_v18 = vpop.f32.mrf.mxu3 }
 0x520   : > { %1315 = vmatmul.msk.f32.vlgmr.msra.gmra.mxu3 %vm698_vm4, %v1007_v18 }
 0x5a3   : > { %v1030_v21 = vpop.f32.mrf.mxu3 }
 0x5a4   : > { %v1033_v34 = vmul.f32 0.03125, %v1030_v21 }
 0x5a6   : > { %1316 = vmatmul.msk.f32.vlgmr.msra.gmra.mxu0 %vm746_vm5, %v1033_v34 }
 0x5ae   : > { %1320 = vmatmul.msk.bf16.vlgmr.msrb.gmra.mxu0 %vm591_vm1, %v1502_v11  ;;  %v1343_v11 = vld [vmem:[%s1681_s10] ss:$0 sm:$0xff] }
 0x623   : > { %v1054_v13 = vpop.f32.mrf.mxu0 }
 0x624   : > { %v1057_v15 = vperm.slane %v1054_v13, 0 }
 0x626   : > { %v1058_v16 = vsub.f32 %v988_v12, %v1057_v15  ;;  %v1059_v19 = vsub.f32 %v989_v10, %v1057_v15 }
 0x628   : > { %v1061_v20 = vmul.f32 %v1059_v19, %v1059_v19  ;;  %v1060_v22 = vmul.f32 %v1058_v16, %v1058_v16 }
 0x62a   : > { %1076 = vmatpush.msra.mxu1 %v1061_v20 }
 0x62b   : > { %v1190_v53 = vpop.f32.mrf.mxu0 }
 0x62c   : > { %1077 = vmatpush.msra.mxu1 %v1060_v22  ;;  %v1191_v2 = vadd.f32 %v1345_v59, %v1190_v53 }
 0x62d   : > { %1317 = vmatmul.msk.f32.vlgmr.msra.gmra.mxu1 %vm698_vm4, %v1552_v46 }
 0x633   : > { %v1192_v61 = vpop.f32.mrf.mxu0 }
 0x634   : > { %v1193_v4 = vadd.f32 %v1345_v59, %v1192_v61 }
 0x6aa   : > { %v1079_v14 = vpop.f32.mrf.mxu1 }
 0x6ab   : > { %1318 = vmatmul.msk.f32.vlgmr.msrb.gmra.mxu2 %vm698_vm4, %v1079_v14 }
 0x72e   : > { %v1102_v23 = vpop.f32.mrf.mxu2 }
 0x72f   : > { %v1105_v24 = vmul.f32 0.03125, %v1102_v23 }
 0x731   : > { %v1106_v25 = vadd.f32 1e-05, %v1105_v24 }
 0x733   : > { %1356 = vrsqrt.f32 %v1106_v25  ;;  %vm1113_vm10 = vweird.f32 %v1106_v25 }
 0x739   : > { %v1357_v26 = vpop.eup %1356 }
 0x73a   : > { %v1108_v28 = vmul.f32 %v1357_v26, %v1106_v25  ;;  %vm1114_vm9 = vweird.f32 %v1357_v26 }
 0x73b   : > { %vm1115_vm11 = vmor %vm1113_vm10, %vm1114_vm9 }
 0x73c   : > { %v1109_v46 = vmul.f32 %v1357_v26, %v1108_v28 }
 0x73e   : > { %v1110_v29 = vmul.f32 0.5, %v1109_v46 }
 0x740   : > { %v1111_v30 = vsub.f32 1.5, %v1110_v29 }
 0x742   : > { %v1112_v31 = vmul.f32 %v1357_v26, %v1111_v30 }
 0x744   : > { %v1116_v32 = vsel %vm1115_vm11, %v1357_v26, %v1112_v31 }
 0x745   : > { %1319 = vmatmul.msk.f32.vlgmr.msrb.gmra.mxu3 %vm746_vm5, %v1116_v32 }
 0x7c8   : > { %v1137_v33 = vpop.f32.mrf.mxu3 }
 0x7c9   : > { %v1140_v35 = vperm.slane %v1137_v33, 0 }
 0x7cb   : > { %v1141_v36 = vmul.f32 %v1140_v35, %v1058_v16  ;;  %v1142_v37 = vmul.f32 %v1140_v35, %v1059_v19 }
 0x7cd   : > { %v1147_v39 = vmul.f32 %v1343_v11, %v1141_v36  ;;  %v1148_v40 = vmul.f32 %v1343_v11, %v1142_v37 }
 0x7cf   : > { %v1153_v41 = vadd.f32 %v1344_v38, %v1147_v39  ;;  %v1154_v42 = vadd.f32 %v1344_v38, %v1148_v40 }
 0x7d1   : > { %v1155_v43 = vmin.f32 %v1153_v41, 20.0  ;;  %v1156_v44 = vmin.f32 %v1154_v42, 20.0 }
 0x7d3   : > { %v1157_v45 = vmul.f32 1.442695, %v1155_v43  ;;  %v1159_v48 = vmul.f32 1.442695, %v1156_v44 }
 0x7d5   : > { %1358 = vpow2.f32 %v1157_v45 }
 0x7d6   : > { %1360 = vpow2.f32 %v1159_v48 }
 0x7db   : > { %v1359_v50 = vpop.eup %1358 }
 0x7dc   : > { %v1361_v51 = vpop.eup %1360  ;;  %v1161_v52 = vadd.f32 2.0, %v1359_v50 }
 0x7dd   : > { %v1162_v54 = vadd.f32 2.0, %v1361_v51 }
 0x7de   : > { %v1163_v55 = vmul.f32 %v1359_v50, %v1161_v52 }
 0x7df   : > { %v1164_v56 = vmul.f32 %v1361_v51, %v1162_v54 }
 0x7e0   : > { %v1167_v57 = vadd.f32 2.0, %v1163_v55  ;;  %v1165_v60 = vmul.f32 %v1163_v55, %v1153_v41 }
 0x7e1   : > { %v1168_v58 = vadd.f32 2.0, %v1164_v56  ;;  %v1166_v63 = vmul.f32 %v1164_v56, %v1154_v42 }
 0x7e2   : > { %1362 = vrcp.f32 %v1167_v57 }
 0x7e3   : > { %1364 = vrcp.f32 %v1168_v58 }
 0x7e8   : > { %v1363_v62 = vpop.eup %1362 }
 0x7e9   : > { %v1365_v0 = vpop.eup %1364  ;;  %v1171_v1 = vmul.f32 %v1363_v62, %v1165_v60 }
 0x7ea   : > { %v1172_v3 = vmul.f32 %v1365_v0, %v1166_v63 }
 0x7eb   : > { %v1195_v5 = vadd.f32 %v1191_v2, %v1171_v1 }
 0x7ec   : > { %v1196_v6 = vadd.f32 %v1193_v4, %v1172_v3 }
 0x7ed   : > { %1197 = vst.msk [vmem:[%s578_s25] sm:$0xff] %vm698_vm4, %v1195_v5 }
 0x7ee   : > { %1198 = vst.msk [vmem:[%s578_s25 + $0x8] sm:$0xff] %vm698_vm4, %v1196_v6 }
 0x7ef PF: > { %s27_s24 = sadd.s32 1, %s1372_s24  }
 0x7f0   : > { %p24_p5 = scmp.ge.s32.totalorder %s27_s24, 4  }
 0x7f2   :  { %26 = sbr.rel (!%p24_p5) target bundleno = 4 (0x4), region = 129 }

</bundles_post_ra>
